<compile_context>
chip_gen: v7x
topology: tpu7x:2x2x1
jax: 0.10.0
libtpu: 0.0.40
codegen_flags: <defaults>
</compile_context>

<pallas_src>
import math
import numpy as np

import jax
import jax.numpy as jnp
from jax.experimental import pallas as pl
from jax.experimental.pallas import tpu as pltpu


# ----------------------------- in-kernel GELU -----------------------------

def _erf_approx(x):
    # Abramowitz & Stegun 7.1.26; max abs err ~1.5e-7 -> matches exact-erf
    # GELU (PyTorch nn.GELU default) to f32 precision with only VPU/EUP ops.
    a1, a2, a3, a4, a5 = 0.254829592, -0.284496736, 1.421413741, -1.453152027, 1.061405429
    p = 0.3275911
    sgn = jnp.where(x >= 0.0, 1.0, -1.0)
    ax = jnp.abs(x)
    t = pl.reciprocal(1.0 + p * ax, approx=False)      # divide on the EUP slot
    poly = ((((a5 * t + a4) * t + a3) * t + a2) * t + a1) * t
    return sgn * (1.0 - poly * jnp.exp(-ax * ax))


def _gelu_exact(x):
    return 0.5 * x * (1.0 + _erf_approx(x * 0.7071067811865476))


# ----------------------------- fused Pallas kernel -----------------------------

def _make_fused_kernel(B, N, P, td, kk):
    """Fused project -> Fold -> concatFuse, all in the (features, tokens) domain.

    Shapes (token_dim=64, B=2, N=16, P=64, kk=9):
      dec_t : (td, B*N)      = (64, 32)     columns ordered (b, n)
      enc_t : (td, B*P)      = (64, 128)    columns ordered (b, p)
      wp    : (kk*td, td)    = (576, 64)    project weight, rows ordered (k, c)
      bp    : (kk*td, 1)
      fold  : (kk*B*N, B*P)  = (288, 128)   0/1 scatter matrix (block-diag in b)
      w1    : (td, 2*td)     = (64, 128)    concatFuse[0].weight (PyTorch layout)
      b1,b2 : (td, 1)
      w2    : (td, td)
      out   : (td, B*P)      = (64, 128)    lane-dense
    """
    BN = B * N

    def kernel(dec_t_ref, enc_t_ref, wp_ref, bp_ref, fold_ref,
               w1_ref, b1_ref, w2_ref, b2_ref, o_ref):
        # 1) project: Linear(td -> td*kk), transposed domain.
        #    y_t[k*td + c, b*N + n] = project(dec)[b, n, c*kk + k]
        y_t = jnp.dot(wp_ref[...], dec_t_ref[...],
                      preferred_element_type=jnp.float32) + bp_ref[...]

        # 2) nn.Fold (col2im) as kk accumulated matmuls with a 0/1 scatter
        #    matrix (block-diagonal over batch).  Row slices only (mult. of 8).
        folded = jnp.dot(y_t[0:td, :], fold_ref[0:BN, :],
                         preferred_element_type=jnp.float32)
        for k in range(1, kk):
            folded = folded + jnp.dot(
                y_t[k * td:(k + 1) * td, :],
                fold_ref[k * BN:(k + 1) * BN, :],
                preferred_element_type=jnp.float32)
        # folded[c, b*P + p] == Fold(project(dec).transpose(1,2))[b, c, p]

        # 3) concatFuse: cat along the feature (sublane) axis, then a single
        #    K = 2*td = 128 matmul, GELU, second Linear.
        cat_t = jnp.concatenate([folded, enc_t_ref[...]], axis=0)   # (2*td, B*P)
        h = jnp.dot(w1_ref[...], cat_t,
                    preferred_element_type=jnp.float32) + b1_ref[...]
        h = _gelu_exact(h)
        o_ref[...] = jnp.dot(w2_ref[...], h,
                             preferred_element_type=jnp.float32) + b2_ref[...]

    return kernel


def fuse_8_4_forward(kparams, dec_fea, enc_fea):
    """dec_fea: (B, N, td), enc_fea: (B, P, td) -> (B, P, td).  Call under jit."""
    B, N, td = dec_fea.shape
    P = enc_fea.shape[1]
    kk = kparams["wp"].shape[0] // td
    # TODO(synk): the `if C == 96:` LayerNorm(dim)+mlp branch is not exercised
    # at token_dim=64 (C != 96) and is therefore not implemented here.

    # Input layout change (tiny, fused into the jitted program): (B,N,C)->(C,B*N)
    dec_t = jnp.transpose(dec_fea, (2, 0, 1)).reshape(td, B * N)
    enc_t = jnp.transpose(enc_fea, (2, 0, 1)).reshape(td, B * P)

    vmem = lambda: pl.BlockSpec(memory_space=pltpu.MemorySpace.VMEM)
    out_t = pl.pallas_call(
        _make_fused_kernel(B, N, P, td, kk),
        out_shape=jax.ShapeDtypeStruct((td, B * P), jnp.float32),
        in_specs=[vmem() for _ in range(9)],
        out_specs=vmem(),
    )(dec_t, enc_t, kparams["wp"], kparams["bp"], kparams["fold"],
      kparams["w1"], kparams["b1"], kparams["w2"], kparams["b2"])

    return out_t.reshape(td, B, P).transpose(1, 2, 0)


fuse_8_4_forward_jit = jax.jit(fuse_8_4_forward)


# ------------------------------ host-side param prep ------------------------------

def build_fold_matrix(output_size, kernel_size, stride, padding):
    """0/1 matrix F[k*L + l, p] realizing nn.Fold's scatter-add as a matmul."""
    H, W = output_size
    kh, kw = kernel_size
    sh, sw = stride
    ph, pw = padding
    nH = (H + 2 * ph - kh) // sh + 1
    nW = (W + 2 * pw - kw) // sw + 1
    L = nH * nW
    F = np.zeros((kh * kw * L, H * W), dtype=np.float32)
    for bh in range(nH):
        for bw in range(nW):
            l = bh * nW + bw
            for i in range(kh):
                for j in range(kw):
                    oh = bh * sh - ph + i
                    ow = bw * sw - pw + j
                    if 0 <= oh < H and 0 <= ow < W:
                        F[(i * kw + j) * L + l, oh * W + ow] = 1.0
    return F, L


def init_torch_params(key, td, kk):
    """Parameters in PyTorch nn.Linear layout: weight (out, in), bias (out,)."""
    ks = jax.random.split(key, 6)

    def u(k, shape, fan_in):
        bound = 1.0 / math.sqrt(fan_in)
        return jax.random.uniform(k, shape, jnp.float32, -bound, bound)

    return dict(
        proj_w=u(ks[0], (td * kk, td), td),      # project.weight
        proj_b=u(ks[1], (td * kk,), td),         # project.bias
        w1=u(ks[2], (td, 2 * td), 2 * td),       # concatFuse[0].weight
        b1=u(ks[3], (td,), 2 * td),
        w2=u(ks[4], (td, td), td),               # concatFuse[2].weight
        b2=u(ks[5], (td,), td),
    )


def prepare_kernel_params(tp, fold_mat, B, N, P, td, kk):
    """Build kernel-layout device arrays once (no per-call host->device copies)."""
    # project weight: rows permuted from (c*kk + k) to (k*td + c) order so the
    # fold step only needs sublane-aligned row slices.
    perm = np.asarray([c * kk + k for k in range(kk) for c in range(td)])
    wp = np.asarray(tp["proj_w"])[perm, :]                        # (kk*td, td)
    bp = np.asarray(tp["proj_b"])[perm].reshape(-1, 1)            # (kk*td, 1)
    # fold scatter matrix, block-diagonal over batch, rows ordered (k, b, n).
    fold_big = np.zeros((kk * B * N, B * P), np.float32)
    for k in range(kk):
        for b in range(B):
            fold_big[k * B * N + b * N: k * B * N + (b + 1) * N,
                     b * P:(b + 1) * P] = fold_mat[k * N:(k + 1) * N, :]
    return dict(
        wp=jnp.asarray(wp),
        bp=jnp.asarray(bp),
        fold=jnp.asarray(fold_big),
        w1=jnp.asarray(tp["w1"]),                                  # (td, 2*td)
        b1=jnp.asarray(np.asarray(tp["b1"]).reshape(-1, 1)),
        w2=jnp.asarray(tp["w2"]),                                  # (td, td)
        b2=jnp.asarray(np.asarray(tp["b2"]).reshape(-1, 1)),
    )


# ------------------------------ reference (non-Pallas) ------------------------------

def reference_forward(tp, dec_fea, enc_fea, cfg):
    B, N, C = dec_fea.shape
    td = cfg["token_dim"]
    kh, kw = cfg["kernel_size"]
    sh, sw = cfg["stride"]
    ph, pw = cfg["padding"]
    Ho = Wo = cfg["img_size"] // cfg["ratio"]
    nH = (Ho + 2 * ph - kh) // sh + 1
    nW = (Wo + 2 * pw - kw) // sw + 1

    x = np.asarray(dec_fea)
    y = x @ np.asarray(tp["proj_w"]).T + np.asarray(tp["proj_b"])   # (B,N,td*9)
    cols = np.transpose(y, (0, 2, 1)).reshape(B, td, kh * kw, N)    # nn.Fold input
    out = np.zeros((B, td, Ho, Wo), dtype=np.float32)
    for bh in range(nH):
        for bw in range(nW):
            l = bh * nW + bw
            for i in range(kh):
                for j in range(kw):
                    oh = bh * sh - ph + i
                    ow = bw * sw - pw + j
                    if 0 <= oh < Ho and 0 <= ow < Wo:
                        out[:, :, oh, ow] += cols[:, :, i * kw + j, l]
    dec_tok = out.reshape(B, td, Ho * Wo).transpose(0, 2, 1)
    cat = np.concatenate([dec_tok, np.asarray(enc_fea)], axis=2)
    h = cat @ np.asarray(tp["w1"]).T + np.asarray(tp["b1"])
    h = np.asarray(jax.nn.gelu(jnp.asarray(h), approximate=False))  # exact-erf GELU
    return h @ np.asarray(tp["w2"]).T + np.asarray(tp["b2"])


# ------------------------------ main ------------------------------

if __name__ == "__main__":
    cfg = dict(token_dim=64, img_size=64, ratio=8,
               kernel_size=(3, 3), stride=(2, 2), padding=(1, 1))
    td = cfg["token_dim"]
    kk = cfg["kernel_size"][0] * cfg["kernel_size"][1]             # 9
    Ho = cfg["img_size"] // cfg["ratio"]                           # 8
    fold_mat, L = build_fold_matrix((Ho, Ho), cfg["kernel_size"],
                                    cfg["stride"], cfg["padding"])  # L = 16
    N = L
    P = Ho * Ho                                                    # 64
    B = 2

    key = jax.random.PRNGKey(0)
    kp, kd, ke = jax.random.split(key, 3)
    torch_params = init_torch_params(kp, td, kk)
    kparams = prepare_kernel_params(torch_params, fold_mat, B, N, P, td, kk)

    dec_fea = jax.random.normal(kd, (B, N, td), jnp.float32)
    enc_fea = jax.random.normal(ke, (B, P, td), jnp.float32)

    out = fuse_8_4_forward_jit(kparams, dec_fea, enc_fea)
    out = jax.block_until_ready(out)

    ref = reference_forward(torch_params, dec_fea, enc_fea, cfg)
    assert out.shape == (B, P, td)
    np.testing.assert_allclose(np.asarray(out), ref, rtol=1e-4, atol=1e-4)
    print("KERNEL_OK")
</pallas_src>

<mosaic_0001>
module attributes {stable_mosaic.version = 11 : i64} {
  func.func @kernel(%arg0: memref<64x32xf32, #tpu.memory_space<vmem>>, %arg1: memref<64x128xf32, #tpu.memory_space<vmem>>, %arg2: memref<576x64xf32, #tpu.memory_space<vmem>>, %arg3: memref<576x1xf32, #tpu.memory_space<vmem>>, %arg4: memref<288x128xf32, #tpu.memory_space<vmem>>, %arg5: memref<64x128xf32, #tpu.memory_space<vmem>>, %arg6: memref<64x1xf32, #tpu.memory_space<vmem>>, %arg7: memref<64x64xf32, #tpu.memory_space<vmem>>, %arg8: memref<64x1xf32, #tpu.memory_space<vmem>>, %arg9: memref<64x128xf32, #tpu.memory_space<vmem>>) attributes {dimension_semantics = [], scalar_prefetch = 0 : i64, scratch_operands = 0 : i64, tpu.core_type = #tpu.core_type<tc>} {
    %c0 = arith.constant 0 : index
    %c0_0 = arith.constant 0 : index
    %0 = vector.load %arg2[%c0, %c0_0] : memref<576x64xf32, #tpu.memory_space<vmem>>, vector<576x64xf32>
    %c0_1 = arith.constant 0 : index
    %c0_2 = arith.constant 0 : index
    %1 = vector.load %arg0[%c0_1, %c0_2] : memref<64x32xf32, #tpu.memory_space<vmem>>, vector<64x32xf32>
    %cst = arith.constant dense<0.000000e+00> : vector<576x32xf32>
    %2 = tpu.matmul %0, %1, %cst {dimension_numbers = #tpu.dot_dimension_numbers<[1], [0], [0], [1], [0, 0, 1, 1], [], []>} : vector<576x64xf32>, vector<64x32xf32>, vector<576x32xf32> -> vector<576x32xf32>
    %c0_3 = arith.constant 0 : index
    %c0_4 = arith.constant 0 : index
    %3 = vector.load %arg3[%c0_3, %c0_4] : memref<576x1xf32, #tpu.memory_space<vmem>>, vector<576x1xf32>
    %4 = vector.broadcast %3 : vector<576x1xf32> to vector<576x32xf32>
    %5 = arith.addf %2, %4 : vector<576x32xf32>
    %6 = vector.extract_strided_slice %5 {offsets = [0, 0], sizes = [64, 32], strides = [1, 1]} : vector<576x32xf32> to vector<64x32xf32>
    %c0_5 = arith.constant 0 : index
    %c0_6 = arith.constant 0 : index
    %7 = vector.load %arg4[%c0_5, %c0_6] : memref<288x128xf32, #tpu.memory_space<vmem>>, vector<32x128xf32>
    %cst_7 = arith.constant dense<0.000000e+00> : vector<64x128xf32>
    %8 = tpu.matmul %6, %7, %cst_7 {dimension_numbers = #tpu.dot_dimension_numbers<[1], [0], [0], [1], [0, 0, 1, 1], [], []>} : vector<64x32xf32>, vector<32x128xf32>, vector<64x128xf32> -> vector<64x128xf32>
    %9 = vector.extract_strided_slice %5 {offsets = [64, 0], sizes = [64, 32], strides = [1, 1]} : vector<576x32xf32> to vector<64x32xf32>
    %c32 = arith.constant 32 : index
    %c0_8 = arith.constant 0 : index
    %10 = vector.load %arg4[%c32, %c0_8] : memref<288x128xf32, #tpu.memory_space<vmem>>, vector<32x128xf32>
    %cst_9 = arith.constant dense<0.000000e+00> : vector<64x128xf32>
    %11 = tpu.matmul %9, %10, %cst_9 {dimension_numbers = #tpu.dot_dimension_numbers<[1], [0], [0], [1], [0, 0, 1, 1], [], []>} : vector<64x32xf32>, vector<32x128xf32>, vector<64x128xf32> -> vector<64x128xf32>
    %12 = arith.addf %8, %11 : vector<64x128xf32>
    %13 = vector.extract_strided_slice %5 {offsets = [128, 0], sizes = [64, 32], strides = [1, 1]} : vector<576x32xf32> to vector<64x32xf32>
    %c64 = arith.constant 64 : index
    %c0_10 = arith.constant 0 : index
    %14 = vector.load %arg4[%c64, %c0_10] : memref<288x128xf32, #tpu.memory_space<vmem>>, vector<32x128xf32>
    %cst_11 = arith.constant dense<0.000000e+00> : vector<64x128xf32>
    %15 = tpu.matmul %13, %14, %cst_11 {dimension_numbers = #tpu.dot_dimension_numbers<[1], [0], [0], [1], [0, 0, 1, 1], [], []>} : vector<64x32xf32>, vector<32x128xf32>, vector<64x128xf32> -> vector<64x128xf32>
    %16 = arith.addf %12, %15 : vector<64x128xf32>
    %17 = vector.extract_strided_slice %5 {offsets = [192, 0], sizes = [64, 32], strides = [1, 1]} : vector<576x32xf32> to vector<64x32xf32>
    %c96 = arith.constant 96 : index
    %c0_12 = arith.constant 0 : index
    %18 = vector.load %arg4[%c96, %c0_12] : memref<288x128xf32, #tpu.memory_space<vmem>>, vector<32x128xf32>
    %cst_13 = arith.constant dense<0.000000e+00> : vector<64x128xf32>
    %19 = tpu.matmul %17, %18, %cst_13 {dimension_numbers = #tpu.dot_dimension_numbers<[1], [0], [0], [1], [0, 0, 1, 1], [], []>} : vector<64x32xf32>, vector<32x128xf32>, vector<64x128xf32> -> vector<64x128xf32>
    %20 = arith.addf %16, %19 : vector<64x128xf32>
    %21 = vector.extract_strided_slice %5 {offsets = [256, 0], sizes = [64, 32], strides = [1, 1]} : vector<576x32xf32> to vector<64x32xf32>
    %c128 = arith.constant 128 : index
    %c0_14 = arith.constant 0 : index
    %22 = vector.load %arg4[%c128, %c0_14] : memref<288x128xf32, #tpu.memory_space<vmem>>, vector<32x128xf32>
    %cst_15 = arith.constant dense<0.000000e+00> : vector<64x128xf32>
    %23 = tpu.matmul %21, %22, %cst_15 {dimension_numbers = #tpu.dot_dimension_numbers<[1], [0], [0], [1], [0, 0, 1, 1], [], []>} : vector<64x32xf32>, vector<32x128xf32>, vector<64x128xf32> -> vector<64x128xf32>
    %24 = arith.addf %20, %23 : vector<64x128xf32>
    %25 = vector.extract_strided_slice %5 {offsets = [320, 0], sizes = [64, 32], strides = [1, 1]} : vector<576x32xf32> to vector<64x32xf32>
    %c160 = arith.constant 160 : index
    %c0_16 = arith.constant 0 : index
    %26 = vector.load %arg4[%c160, %c0_16] : memref<288x128xf32, #tpu.memory_space<vmem>>, vector<32x128xf32>
    %cst_17 = arith.constant dense<0.000000e+00> : vector<64x128xf32>
    %27 = tpu.matmul %25, %26, %cst_17 {dimension_numbers = #tpu.dot_dimension_numbers<[1], [0], [0], [1], [0, 0, 1, 1], [], []>} : vector<64x32xf32>, vector<32x128xf32>, vector<64x128xf32> -> vector<64x128xf32>
    %28 = arith.addf %24, %27 : vector<64x128xf32>
    %29 = vector.extract_strided_slice %5 {offsets = [384, 0], sizes = [64, 32], strides = [1, 1]} : vector<576x32xf32> to vector<64x32xf32>
    %c192 = arith.constant 192 : index
    %c0_18 = arith.constant 0 : index
    %30 = vector.load %arg4[%c192, %c0_18] : memref<288x128xf32, #tpu.memory_space<vmem>>, vector<32x128xf32>
    %cst_19 = arith.constant dense<0.000000e+00> : vector<64x128xf32>
    %31 = tpu.matmul %29, %30, %cst_19 {dimension_numbers = #tpu.dot_dimension_numbers<[1], [0], [0], [1], [0, 0, 1, 1], [], []>} : vector<64x32xf32>, vector<32x128xf32>, vector<64x128xf32> -> vector<64x128xf32>
    %32 = arith.addf %28, %31 : vector<64x128xf32>
    %33 = vector.extract_strided_slice %5 {offsets = [448, 0], sizes = [64, 32], strides = [1, 1]} : vector<576x32xf32> to vector<64x32xf32>
    %c224 = arith.constant 224 : index
    %c0_20 = arith.constant 0 : index
    %34 = vector.load %arg4[%c224, %c0_20] : memref<288x128xf32, #tpu.memory_space<vmem>>, vector<32x128xf32>
    %cst_21 = arith.constant dense<0.000000e+00> : vector<64x128xf32>
    %35 = tpu.matmul %33, %34, %cst_21 {dimension_numbers = #tpu.dot_dimension_numbers<[1], [0], [0], [1], [0, 0, 1, 1], [], []>} : vector<64x32xf32>, vector<32x128xf32>, vector<64x128xf32> -> vector<64x128xf32>
    %36 = arith.addf %32, %35 : vector<64x128xf32>
    %37 = vector.extract_strided_slice %5 {offsets = [512, 0], sizes = [64, 32], strides = [1, 1]} : vector<576x32xf32> to vector<64x32xf32>
    %c256 = arith.constant 256 : index
    %c0_22 = arith.constant 0 : index
    %38 = vector.load %arg4[%c256, %c0_22] : memref<288x128xf32, #tpu.memory_space<vmem>>, vector<32x128xf32>
    %cst_23 = arith.constant dense<0.000000e+00> : vector<64x128xf32>
    %39 = tpu.matmul %37, %38, %cst_23 {dimension_numbers = #tpu.dot_dimension_numbers<[1], [0], [0], [1], [0, 0, 1, 1], [], []>} : vector<64x32xf32>, vector<32x128xf32>, vector<64x128xf32> -> vector<64x128xf32>
    %40 = arith.addf %36, %39 : vector<64x128xf32>
    %c0_24 = arith.constant 0 : index
    %c0_25 = arith.constant 0 : index
    %41 = vector.load %arg1[%c0_24, %c0_25] : memref<64x128xf32, #tpu.memory_space<vmem>>, vector<64x128xf32>
    %42 = tpu.concatenate %40, %41 in 0 : vector<64x128xf32>, vector<64x128xf32> -> vector<128x128xf32>
    %c0_26 = arith.constant 0 : index
    %c0_27 = arith.constant 0 : index
    %43 = vector.load %arg5[%c0_26, %c0_27] : memref<64x128xf32, #tpu.memory_space<vmem>>, vector<64x128xf32>
    %cst_28 = arith.constant dense<0.000000e+00> : vector<64x128xf32>
    %44 = tpu.matmul %43, %42, %cst_28 {dimension_numbers = #tpu.dot_dimension_numbers<[1], [0], [0], [1], [0, 0, 1, 1], [], []>} : vector<64x128xf32>, vector<128x128xf32>, vector<64x128xf32> -> vector<64x128xf32>
    %c0_29 = arith.constant 0 : index
    %c0_30 = arith.constant 0 : index
    %45 = vector.load %arg6[%c0_29, %c0_30] : memref<64x1xf32, #tpu.memory_space<vmem>>, vector<64x1xf32>
    %46 = vector.broadcast %45 : vector<64x1xf32> to vector<64x128xf32>
    %47 = arith.addf %44, %46 : vector<64x128xf32>
    %cst_31 = arith.constant 5.000000e-01 : f32
    %48 = vector.broadcast %cst_31 : f32 to vector<64x128xf32>
    %49 = arith.mulf %48, %47 : vector<64x128xf32>
    %cst_32 = arith.constant 0.707106769 : f32
    %50 = vector.broadcast %cst_32 : f32 to vector<64x128xf32>
    %51 = arith.mulf %47, %50 : vector<64x128xf32>
    %cst_33 = arith.constant 0.000000e+00 : f32
    %52 = vector.broadcast %cst_33 : f32 to vector<64x128xf32>
    %53 = arith.cmpf oge, %51, %52 : vector<64x128xf32>
    %cst_34 = arith.constant 1.000000e+00 : f32
    %cst_35 = arith.constant -1.000000e+00 : f32
    %54 = vector.broadcast %cst_34 : f32 to vector<64x128xf32>
    %55 = vector.broadcast %cst_35 : f32 to vector<64x128xf32>
    %56 = arith.select %53, %54, %55 : vector<64x128xi1>, vector<64x128xf32>
    %57 = math.absf %51 : vector<64x128xf32>
    %cst_36 = arith.constant 0.327591091 : f32
    %58 = vector.broadcast %cst_36 : f32 to vector<64x128xf32>
    %59 = arith.mulf %58, %57 : vector<64x128xf32>
    %cst_37 = arith.constant 1.000000e+00 : f32
    %60 = vector.broadcast %cst_37 : f32 to vector<64x128xf32>
    %61 = arith.addf %60, %59 : vector<64x128xf32>
    %62 = tpu.reciprocal %61 : vector<64x128xf32> -> vector<64x128xf32>
    %cst_38 = arith.constant 1.06140542 : f32
    %63 = vector.broadcast %cst_38 : f32 to vector<64x128xf32>
    %64 = arith.mulf %63, %62 : vector<64x128xf32>
    %cst_39 = arith.constant -1.45315206 : f32
    %65 = vector.broadcast %cst_39 : f32 to vector<64x128xf32>
    %66 = arith.addf %64, %65 : vector<64x128xf32>
    %67 = arith.mulf %66, %62 : vector<64x128xf32>
    %cst_40 = arith.constant 1.42141378 : f32
    %68 = vector.broadcast %cst_40 : f32 to vector<64x128xf32>
    %69 = arith.addf %67, %68 : vector<64x128xf32>
    %70 = arith.mulf %69, %62 : vector<64x128xf32>
    %cst_41 = arith.constant -0.284496725 : f32
    %71 = vector.broadcast %cst_41 : f32 to vector<64x128xf32>
    %72 = arith.addf %70, %71 : vector<64x128xf32>
    %73 = arith.mulf %72, %62 : vector<64x128xf32>
    %cst_42 = arith.constant 0.254829586 : f32
    %74 = vector.broadcast %cst_42 : f32 to vector<64x128xf32>
    %75 = arith.addf %73, %74 : vector<64x128xf32>
    %76 = arith.mulf %75, %62 : vector<64x128xf32>
    %cst_43 = arith.constant 0.000000e+00 : f32
    %77 = vector.broadcast %cst_43 : f32 to vector<64x128xf32>
    %78 = arith.subf %77, %57 : vector<64x128xf32>
    %79 = arith.mulf %78, %57 : vector<64x128xf32>
    %80 = math.exp %79 : vector<64x128xf32>
    %81 = arith.mulf %76, %80 : vector<64x128xf32>
    %cst_44 = arith.constant 1.000000e+00 : f32
    %82 = vector.broadcast %cst_44 : f32 to vector<64x128xf32>
    %83 = arith.subf %82, %81 : vector<64x128xf32>
    %84 = arith.mulf %56, %83 : vector<64x128xf32>
    %cst_45 = arith.constant 1.000000e+00 : f32
    %85 = vector.broadcast %cst_45 : f32 to vector<64x128xf32>
    %86 = arith.addf %85, %84 : vector<64x128xf32>
    %87 = arith.mulf %49, %86 : vector<64x128xf32>
    %c0_46 = arith.constant 0 : index
    %c0_47 = arith.constant 0 : index
    %88 = vector.load %arg7[%c0_46, %c0_47] : memref<64x64xf32, #tpu.memory_space<vmem>>, vector<64x64xf32>
    %cst_48 = arith.constant dense<0.000000e+00> : vector<64x128xf32>
    %89 = tpu.matmul %88, %87, %cst_48 {dimension_numbers = #tpu.dot_dimension_numbers<[1], [0], [0], [1], [0, 0, 1, 1], [], []>} : vector<64x64xf32>, vector<64x128xf32>, vector<64x128xf32> -> vector<64x128xf32>
    %c0_49 = arith.constant 0 : index
    %c0_50 = arith.constant 0 : index
    %90 = vector.load %arg8[%c0_49, %c0_50] : memref<64x1xf32, #tpu.memory_space<vmem>>, vector<64x1xf32>
    %91 = vector.broadcast %90 : vector<64x1xf32> to vector<64x128xf32>
    %92 = arith.addf %89, %91 : vector<64x128xf32>
    %c0_51 = arith.constant 0 : index
    %c0_52 = arith.constant 0 : index
    %93 = vector.load %arg9[%c0_51, %c0_52] : memref<64x128xf32, #tpu.memory_space<vmem>>, vector<64x128xf32>
    tpu.vector_store %arg9[%c0_51, %c0_52], %92 {strides = array<i32>} : memref<64x128xf32, #tpu.memory_space<vmem>>, vector<64x128xf32>,
    return
  }
}

</mosaic_0001>

<bundles_post_ra>
// kernel: fuse_8_4_forward.1
= control target key start
LH: loop header
LB: loop body
LE: loop exit
PB: predicated region body
PF: predicated region fallthrough
CT: control target
= control target key end

     0   :  { %v4006_v0 = vmov 0   ;;  %vm544_vm0 = vcmask 523264   ;;  %vm1194_vm1 = vcmask 261120   ;;  %s5184_s3 = inlined_call_operand.vmem [shape: f32[576,1], index: 3, kind: input, shape index: {}]   ;;  %s5185_s0 = inlined_call_operand.vmem [shape: f32[64,32], index: 0, kind: input, shape index: {}]   ;;  %s5186_s2 = inlined_call_operand.vmem [shape: f32[576,64], index: 2, kind: input, shape index: {}]   ;;  %s5187_s4 = inlined_call_operand.vmem [shape: f32[288,128], index: 4, kind: input, shape index: {}]   ;;  %s5188_s6 = inlined_call_operand.vmem [shape: f32[64,1], index: 6, kind: input, shape index: {}]   ;;  %s5189_s8 = inlined_call_operand.vmem [shape: f32[64,1], index: 8, kind: input, shape index: {}]   ;;  %s5190_s5 = inlined_call_operand.vmem [shape: f32[64,128], index: 5, kind: input, shape index: {}]   ;;  %s5191_s1 = inlined_call_operand.vmem [shape: f32[64,128], index: 1, kind: input, shape index: {}]   ;;  %s5192_s7 = inlined_call_operand.vmem [shape: f32[64,64], index: 7, kind: input, shape index: {}]   ;;  %s5193_s9 = inlined_call_operand.vmem [shape: f32[64,128], index: 9, kind: output, shape index: {}]  }
   0x1   :  { %3973 = vset.pattern.permute.xlu1 %v4006_v0  ;;  %3972 = vset.pattern.permute.xlu0 %v4006_v0  ;;  %v122_v1 = vld [vmem:[%s5184_s3 + $0x50] sm:$0xff]  ;;  %v120_v2 = vld [vmem:[%s5184_s3 + $0x40] sm:$0xff]  ;;  %v105_v4 = vld [vmem:[%s5185_s0 + $0x8] sm:$0xff] }
   0x2   :  { %v104_v3 = vld [vmem:[%s5185_s0] sm:$0xff]  ;;  %236 = vperm.xlu1 %3973, %v122_v1   ;;  %226 = vperm.xlu0 %3972, %v120_v2   ;;  %v123_v6 = vld [vmem:[%s5184_s3 + $0x58] sm:$0xff]  ;;  %v106_v7 = vld [vmem:[%s5185_s0 + $0x10] sm:$0xff] }
   0x3   :  { %v3770_v5 = vpack.c.bf16 %v105_v4, %v104_v3  ;;  %v107_v8 = vld [vmem:[%s5185_s0 + $0x18] sm:$0xff]  ;;  %v121_v9 = vld [vmem:[%s5184_s3 + $0x48] sm:$0xff]  ;;  %v108_v11 = vld [vmem:[%s5185_s0 + $0x20] sm:$0xff] }
   0x4   :  { %v3774_v10 = vpack.c.bf16 %v107_v8, %v106_v7  ;;  %v109_v12 = vld [vmem:[%s5185_s0 + $0x28] sm:$0xff]  ;;  %v32_v15 = vld [vmem:[%s5186_s2] sm:$0xff]  ;;  %v110_v17 = vld [vmem:[%s5185_s0 + $0x30] sm:$0xff] }
   0x5   :  { %3771 = vmatprep.subr.bf16.mxu0 %v3770_v5  ;;  %v125_v13 = vld [vmem:[%s5184_s3 + $0x68] sm:$0xff]  ;;  %v3778_v14 = vpack.c.bf16 %v109_v12, %v108_v11  ;;  %v124_v16 = vld [vmem:[%s5184_s3 + $0x60] sm:$0xff]  ;;  %v111_v18 = vld [vmem:[%s5185_s0 + $0x38] sm:$0xff]  ;;  %3410 = vmatprep.mubr.msk.f32.mxu0 %vm544_vm0, %v32_v15 }
   0x6   :  { %3773 = vmatpush3.bf16.msra.mxu0 %v3770_v5  ;;  %241 = vperm.xlu1 %3973, %v123_v6   ;;  %v127_v19 = vld [vmem:[%s5184_s3 + $0x78] sm:$0xff]  ;;  %v3782_v20 = vpack.c.bf16 %v111_v18, %v110_v17  ;;  %v126_v21 = vld [vmem:[%s5184_s3 + $0x70] sm:$0xff]  ;;  %v113_v22 = vld [vmem:[%s5184_s3 + $0x8] sm:$0xff] }
   0x7   :  { %231 = vperm.xlu0 %3972, %v121_v9   ;;  %3775 = vmatprep.subr.bf16.mxu0 %v3774_v10  ;;  %v112_v23 = vld [vmem:[%s5184_s3] sm:$0xff]  ;;  %v33_v24 = vld [vmem:[%s5186_s2 + $0x8] sm:$0xff]  ;;  %v115_v25 = vld [vmem:[%s5184_s3 + $0x18] sm:$0xff] }
   0x8   :  { %v34_v26 = vld [vmem:[%s5186_s2 + $0x10] sm:$0xff]  ;;  %v35_v28 = vld [vmem:[%s5186_s2 + $0x18] sm:$0xff]  ;;  %v117_v29 = vld [vmem:[%s5184_s3 + $0x28] sm:$0xff] }
   0x9   :  { %v114_v27 = vld [vmem:[%s5184_s3 + $0x10] sm:$0xff]  ;;  %v36_v30 = vld [vmem:[%s5186_s2 + $0x20] sm:$0xff]  ;;  %v37_v32 = vld [vmem:[%s5186_s2 + $0x28] sm:$0xff] }
   0xa   :  { %3777 = vmatpush3.bf16.msra.mxu0 %v3774_v10  ;;  %251 = vperm.xlu1 %3973, %v125_v13   ;;  %v116_v31 = vld [vmem:[%s5184_s3 + $0x20] sm:$0xff]  ;;  %v119_v33 = vld [vmem:[%s5184_s3 + $0x38] sm:$0xff]  ;;  %v38_v34 = vld [vmem:[%s5186_s2 + $0x30] sm:$0xff] }
   0xb   :  { %246 = vperm.xlu0 %3972, %v124_v16   ;;  %3779 = vmatprep.subr.bf16.mxu0 %v3778_v14  ;;  %v118_v35 = vld [vmem:[%s5184_s3 + $0x30] sm:$0xff]  ;;  %v39_v36 = vld [vmem:[%s5186_s2 + $0x38] sm:$0xff]  ;;  %v129_v37 = vld [vmem:[%s5184_s3 + $0x88] sm:$0xff] }
   0xc   :  { %v40_v38 = vld [vmem:[%s5186_s2 + $0x40] sm:$0xff]  ;;  %v41_v40 = vld [vmem:[%s5186_s2 + $0x48] sm:$0xff]  ;;  %v131_v41 = vld [vmem:[%s5184_s3 + $0x98] sm:$0xff] }
   0xd   :  { %v128_v39 = vld [vmem:[%s5184_s3 + $0x80] sm:$0xff]  ;;  %v42_v42 = vld [vmem:[%s5186_s2 + $0x50] sm:$0xff]  ;;  %v43_v44 = vld [vmem:[%s5186_s2 + $0x58] sm:$0xff] }
   0xe   :  { %3781 = vmatpush3.bf16.msra.mxu0 %v3778_v14  ;;  %261 = vperm.xlu1 %3973, %v127_v19   ;;  %v130_v43 = vld [vmem:[%s5184_s3 + $0x90] sm:$0xff]  ;;  %v133_v45 = vld [vmem:[%s5184_s3 + $0xa8] sm:$0xff]  ;;  %v44_v46 = vld [vmem:[%s5186_s2 + $0x60] sm:$0xff] }
   0xf   :  { %256 = vperm.xlu0 %3972, %v126_v21   ;;  %3783 = vmatprep.subr.bf16.mxu0 %v3782_v20  ;;  %v132_v47 = vld [vmem:[%s5184_s3 + $0xa0] sm:$0xff]  ;;  %v45_v48 = vld [vmem:[%s5186_s2 + $0x68] sm:$0xff]  ;;  %v135_v49 = vld [vmem:[%s5184_s3 + $0xb8] sm:$0xff] }
  0x10   :  { %v46_v50 = vld [vmem:[%s5186_s2 + $0x70] sm:$0xff]  ;;  %v47_v52 = vld [vmem:[%s5186_s2 + $0x78] sm:$0xff]  ;;  %v137_v53 = vld [vmem:[%s5184_s3 + $0xc8] sm:$0xff] }
  0x11   :  { %v134_v51 = vld [vmem:[%s5184_s3 + $0xb0] sm:$0xff]  ;;  %v48_v54 = vld [vmem:[%s5186_s2 + $0x80] sm:$0xff]  ;;  %v49_v56 = vld [vmem:[%s5186_s2 + $0x88] sm:$0xff] }
  0x12   :  { %3785 = vmatpush3.bf16.msra.mxu0 %v3782_v20  ;;  %191 = vperm.xlu1 %3973, %v113_v22   ;;  %v136_v55 = vld [vmem:[%s5184_s3 + $0xc0] sm:$0xff]  ;;  %v139_v57 = vld [vmem:[%s5184_s3 + $0xd8] sm:$0xff]  ;;  %v50_v58 = vld [vmem:[%s5186_s2 + $0x90] sm:$0xff] }
  0x13   :  { %186 = vperm.xlu0 %3972, %v112_v23   ;;  %v138_v59 = vld [vmem:[%s5184_s3 + $0xd0] sm:$0xff]  ;;  %v51_v60 = vld [vmem:[%s5186_s2 + $0x98] sm:$0xff]  ;;  %v141_v61 = vld [vmem:[%s5184_s3 + $0xe8] sm:$0xff] }
  0x14   :  { %v52_v62 = vld [vmem:[%s5186_s2 + $0xa0] sm:$0xff]  ;;  %v53_v0 = vld [vmem:[%s5186_s2 + $0xa8] sm:$0xff]  ;;  %v143_v1 = vld [vmem:[%s5184_s3 + $0xf8] sm:$0xff] }
  0x15   :  { %3411 = vmatmul.mubr.msk.f32.vlgmr.msra.gmra.mrb[0].mxu0 %vm544_vm0, %v33_v24  ;;  %v140_v63 = vld [vmem:[%s5184_s3 + $0xe0] sm:$0xff]  ;;  %v54_v2 = vld [vmem:[%s5186_s2 + $0xb0] sm:$0xff]  ;;  %v55_v4 = vld [vmem:[%s5186_s2 + $0xb8] sm:$0xff] }
  0x16   :  { %201 = vperm.xlu1 %3973, %v115_v25   ;;  %3413 = vmatprep.mubr.msk.f32.mxu0 %vm544_vm0, %v34_v26  ;;  %v142_v3 = vld [vmem:[%s5184_s3 + $0xf0] sm:$0xff]  ;;  %v145_v5 = vld [vmem:[%s5184_s3 + $0x108] sm:$0xff]  ;;  %v56_v6 = vld [vmem:[%s5186_s2 + $0xc0] sm:$0xff] }
  0x17   :  { %196 = vperm.xlu0 %3972, %v114_v27   ;;  %v144_v7 = vld [vmem:[%s5184_s3 + $0x100] sm:$0xff]  ;;  %v57_v8 = vld [vmem:[%s5186_s2 + $0xc8] sm:$0xff]  ;;  %v147_v9 = vld [vmem:[%s5184_s3 + $0x118] sm:$0xff] }
  0x18   :  { %v58_v10 = vld [vmem:[%s5186_s2 + $0xd0] sm:$0xff]  ;;  %v59_v12 = vld [vmem:[%s5186_s2 + $0xd8] sm:$0xff]  ;;  %v149_v13 = vld [vmem:[%s5184_s3 + $0x128] sm:$0xff] }
  0x19   :  { %3414 = vmatmul.mubr.msk.f32.gmra.mrb[2].mxu0 %vm544_vm0, %v35_v28  ;;  %v146_v11 = vld [vmem:[%s5184_s3 + $0x110] sm:$0xff]  ;;  %v60_v14 = vld [vmem:[%s5186_s2 + $0xe0] sm:$0xff]  ;;  %v61_v16 = vld [vmem:[%s5186_s2 + $0xe8] sm:$0xff] }
  0x1a   :  { %211 = vperm.xlu1 %3973, %v117_v29   ;;  %3416 = vmatprep.mubr.msk.f32.mxu0 %vm544_vm0, %v36_v30  ;;  %v148_v15 = vld [vmem:[%s5184_s3 + $0x120] sm:$0xff]  ;;  %v151_v17 = vld [vmem:[%s5184_s3 + $0x138] sm:$0xff]  ;;  %v62_v18 = vld [vmem:[%s5186_s2 + $0xf0] sm:$0xff] }
  0x1b   :  { %206 = vperm.xlu0 %3972, %v116_v31   ;;  %v150_v19 = vld [vmem:[%s5184_s3 + $0x130] sm:$0xff]  ;;  %v63_v20 = vld [vmem:[%s5186_s2 + $0xf8] sm:$0xff]  ;;  %v153_v21 = vld [vmem:[%s5184_s3 + $0x148] sm:$0xff] }
  0x1c   :  { %v64_v22 = vld [vmem:[%s5186_s2 + $0x100] sm:$0xff]  ;;  %v65_v24 = vld [vmem:[%s5186_s2 + $0x108] sm:$0xff]  ;;  %v155_v25 = vld [vmem:[%s5184_s3 + $0x158] sm:$0xff] }
  0x1d   :  { %3417 = vmatmul.mubr.msk.f32.gmra.mrb[4].mxu0 %vm544_vm0, %v37_v32  ;;  %v152_v23 = vld [vmem:[%s5184_s3 + $0x140] sm:$0xff]  ;;  %v66_v26 = vld [vmem:[%s5186_s2 + $0x110] sm:$0xff]  ;;  %v67_v28 = vld [vmem:[%s5186_s2 + $0x118] sm:$0xff] }
  0x1e   :  { %221 = vperm.xlu1 %3973, %v119_v33   ;;  %3419 = vmatprep.mubr.msk.f32.mxu0 %vm544_vm0, %v38_v34  ;;  %v154_v27 = vld [vmem:[%s5184_s3 + $0x150] sm:$0xff]  ;;  %v157_v29 = vld [vmem:[%s5184_s3 + $0x168] sm:$0xff]  ;;  %v68_v30 = vld [vmem:[%s5186_s2 + $0x120] sm:$0xff] }
  0x1f   :  { %216 = vperm.xlu0 %3972, %v118_v35   ;;  %v156_v31 = vld [vmem:[%s5184_s3 + $0x160] sm:$0xff]  ;;  %v69_v32 = vld [vmem:[%s5186_s2 + $0x128] sm:$0xff]  ;;  %v159_v33 = vld [vmem:[%s5184_s3 + $0x178] sm:$0xff] }
  0x20   :  { %v70_v34 = vld [vmem:[%s5186_s2 + $0x130] sm:$0xff] }
  0x21   :  { %3420 = vmatmul.mubr.msk.f32.gmra.mrb[6].mxu0 %vm544_vm0, %v39_v36  ;;  %v158_v35 = vld [vmem:[%s5184_s3 + $0x170] sm:$0xff]  ;;  %v71_v36 = vld [vmem:[%s5186_s2 + $0x138] sm:$0xff] }
  0x22   :  { %271 = vperm.xlu1 %3973, %v129_v37   ;;  %3422 = vmatprep.mubr.msk.f32.mxu0 %vm544_vm0, %v40_v38  ;;  %v161_v37 = vld [vmem:[%s5184_s3 + $0x188] sm:$0xff]  ;;  %v72_v38 = vld [vmem:[%s5186_s2 + $0x140] sm:$0xff] }
  0x23   :  { %266 = vperm.xlu0 %3972, %v128_v39   ;;  %v160_v39 = vld [vmem:[%s5184_s3 + $0x180] sm:$0xff] }
  0x25   :  { %3423 = vmatmul.mubr.msk.f32.gmra.mrb[8].mxu0 %vm544_vm0, %v41_v40  ;;  %v73_v40 = vld [vmem:[%s5186_s2 + $0x148] sm:$0xff] }
  0x26   :  { %281 = vperm.xlu1 %3973, %v131_v41   ;;  %3425 = vmatprep.mubr.msk.f32.mxu0 %vm544_vm0, %v42_v42  ;;  %v163_v41 = vld [vmem:[%s5184_s3 + $0x198] sm:$0xff]  ;;  %v74_v42 = vld [vmem:[%s5186_s2 + $0x150] sm:$0xff] }
  0x27   :  { %276 = vperm.xlu0 %3972, %v130_v43   ;;  %v162_v43 = vld [vmem:[%s5184_s3 + $0x190] sm:$0xff] }
  0x29   :  { %3426 = vmatmul.mubr.msk.f32.gmra.mrb[10].mxu0 %vm544_vm0, %v43_v44  ;;  %v75_v44 = vld [vmem:[%s5186_s2 + $0x158] sm:$0xff] }
  0x2a   :  { %291 = vperm.xlu1 %3973, %v133_v45   ;;  %3428 = vmatprep.mubr.msk.f32.mxu0 %vm544_vm0, %v44_v46  ;;  %v165_v45 = vld [vmem:[%s5184_s3 + $0x1a8] sm:$0xff]  ;;  %v76_v46 = vld [vmem:[%s5186_s2 + $0x160] sm:$0xff] }
  0x2b   :  { %286 = vperm.xlu0 %3972, %v132_v47   ;;  %v164_v47 = vld [vmem:[%s5184_s3 + $0x1a0] sm:$0xff] }
  0x2d   :  { %3429 = vmatmul.mubr.msk.f32.gmra.mrb[12].mxu0 %vm544_vm0, %v45_v48  ;;  %v77_v48 = vld [vmem:[%s5186_s2 + $0x168] sm:$0xff] }
  0x2e   :  { %301 = vperm.xlu1 %3973, %v135_v49   ;;  %3431 = vmatprep.mubr.msk.f32.mxu0 %vm544_vm0, %v46_v50  ;;  %v167_v49 = vld [vmem:[%s5184_s3 + $0x1b8] sm:$0xff]  ;;  %v78_v50 = vld [vmem:[%s5186_s2 + $0x170] sm:$0xff] }
  0x2f   :  { %296 = vperm.xlu0 %3972, %v134_v51   ;;  %v166_v51 = vld [vmem:[%s5184_s3 + $0x1b0] sm:$0xff] }
  0x31   :  { %3432 = vmatmul.mubr.msk.f32.gmra.mrb[14].mxu0 %vm544_vm0, %v47_v52  ;;  %v79_v52 = vld [vmem:[%s5186_s2 + $0x178] sm:$0xff] }
  0x32   :  { %311 = vperm.xlu1 %3973, %v137_v53   ;;  %3434 = vmatprep.mubr.msk.f32.mxu0 %vm544_vm0, %v48_v54  ;;  %v169_v53 = vld [vmem:[%s5184_s3 + $0x1c8] sm:$0xff]  ;;  %v80_v54 = vld [vmem:[%s5186_s2 + $0x180] sm:$0xff] }
  0x33   :  { %306 = vperm.xlu0 %3972, %v136_v55   ;;  %v168_v55 = vld [vmem:[%s5184_s3 + $0x1c0] sm:$0xff] }
  0x35   :  { %3435 = vmatmul.mubr.msk.f32.gmra.mrb[16].mxu0 %vm544_vm0, %v49_v56  ;;  %v81_v56 = vld [vmem:[%s5186_s2 + $0x188] sm:$0xff] }
  0x36   :  { %321 = vperm.xlu1 %3973, %v139_v57   ;;  %3437 = vmatprep.mubr.msk.f32.mxu0 %vm544_vm0, %v50_v58  ;;  %v1190_v57 = vld [vmem:[%s5187_s4 + $0x20] sm:$0xff]  ;;  %v1191_v58 = vld [vmem:[%s5187_s4 + $0x28] sm:$0xff] }
  0x37   :  { %316 = vperm.xlu0 %3972, %v138_v59   ;;  %v171_v59 = vld [vmem:[%s5184_s3 + $0x1d8] sm:$0xff] }
  0x39   :  { %3438 = vmatmul.mubr.msk.f32.gmra.mrb[18].mxu0 %vm544_vm0, %v51_v60  ;;  %v82_v60 = vld [vmem:[%s5186_s2 + $0x190] sm:$0xff] }
  0x3a   :  { %331 = vperm.xlu1 %3973, %v141_v61   ;;  %3440 = vmatprep.mubr.msk.f32.mxu0 %vm544_vm0, %v52_v62  ;;  %v3786_v61 = vpack.c.bf16 %v1191_v58, %v1190_v57  ;;  %v170_v62 = vld [vmem:[%s5184_s3 + $0x1d0] sm:$0xff] }
  0x3b   :  { %326 = vperm.xlu0 %3972, %v140_v63   ;;  %v83_v63 = vld [vmem:[%s5186_s2 + $0x198] sm:$0xff] }
  0x3c   :  { %3787 = vmatprep.subr.bf16.mxu1 %v3786_v61 }
  0x3d   :  { %3441 = vmatmul.mubr.msk.f32.gmra.mrb[20].mxu0 %vm544_vm0, %v53_v0  ;;  %v1192_v0 = vld [vmem:[%s5187_s4 + $0x30] sm:$0xff]  ;;  %3789 = vmatpush3.bf16.msra.mxu1 %v3786_v61 }
  0x3e   :  { %341 = vperm.xlu1 %3973, %v143_v1   ;;  %3443 = vmatprep.mubr.msk.f32.mxu0 %vm544_vm0, %v54_v2  ;;  %v1193_v1 = vld [vmem:[%s5187_s4 + $0x38] sm:$0xff]  ;;  %v173_v2 = vld [vmem:[%s5184_s3 + $0x1e8] sm:$0xff] }
  0x3f   :  { %336 = vperm.xlu0 %3972, %v142_v3   ;;  %v84_v3 = vld [vmem:[%s5186_s2 + $0x1a0] sm:$0xff] }
  0x41   :  { %3444 = vmatmul.mubr.msk.f32.gmra.mrb[22].mxu0 %vm544_vm0, %v55_v4  ;;  %v3790_v4 = vpack.c.bf16 %v1193_v1, %v1192_v0 }
  0x42   :  { %351 = vperm.xlu1 %3973, %v145_v5   ;;  %3446 = vmatprep.mubr.msk.f32.mxu0 %vm544_vm0, %v56_v6  ;;  %v172_v5 = vld [vmem:[%s5184_s3 + $0x1e0] sm:$0xff]  ;;  %v85_v6 = vld [vmem:[%s5186_s2 + $0x1a8] sm:$0xff] }
  0x43   :  { %346 = vperm.xlu0 %3972, %v144_v7   ;;  %3791 = vmatprep.subr.bf16.mxu1 %v3790_v4  ;;  %v175_v7 = vld [vmem:[%s5184_s3 + $0x1f8] sm:$0xff] }
  0x44   :  { %3793 = vmatpush3.bf16.msra.mxu1 %v3790_v4 }
  0x45   :  { %3447 = vmatmul.mubr.msk.f32.gmra.mrb[24].mxu0 %vm544_vm0, %v57_v8  ;;  %v86_v8 = vld [vmem:[%s5186_s2 + $0x1b0] sm:$0xff] }
  0x46   :  { %361 = vperm.xlu1 %3973, %v147_v9   ;;  %3449 = vmatprep.mubr.msk.f32.mxu0 %vm544_vm0, %v58_v10  ;;  %v174_v9 = vld [vmem:[%s5184_s3 + $0x1f0] sm:$0xff]  ;;  %v87_v10 = vld [vmem:[%s5186_s2 + $0x1b8] sm:$0xff] }
  0x47   :  { %356 = vperm.xlu0 %3972, %v146_v11   ;;  %v177_v11 = vld [vmem:[%s5184_s3 + $0x208] sm:$0xff] }
  0x49   :  { %3450 = vmatmul.mubr.msk.f32.gmra.mrb[26].mxu0 %vm544_vm0, %v59_v12  ;;  %v88_v12 = vld [vmem:[%s5186_s2 + $0x1c0] sm:$0xff] }
  0x4a   :  { %371 = vperm.xlu1 %3973, %v149_v13   ;;  %3452 = vmatprep.mubr.msk.f32.mxu0 %vm544_vm0, %v60_v14  ;;  %v176_v13 = vld [vmem:[%s5184_s3 + $0x200] sm:$0xff]  ;;  %v89_v14 = vld [vmem:[%s5186_s2 + $0x1c8] sm:$0xff] }
  0x4b   :  { %366 = vperm.xlu0 %3972, %v148_v15   ;;  %v1186_v15 = vld [vmem:[%s5187_s4] sm:$0xff] }
  0x4d   :  { %3453 = vmatmul.mubr.msk.f32.gmra.mrb[28].mxu0 %vm544_vm0, %v61_v16  ;;  %v1187_v16 = vld [vmem:[%s5187_s4 + $0x8] sm:$0xff] }
  0x4e   :  { %381 = vperm.xlu1 %3973, %v151_v17   ;;  %3455 = vmatprep.mubr.msk.f32.mxu0 %vm544_vm0, %v62_v18  ;;  %v179_v17 = vld [vmem:[%s5184_s3 + $0x218] sm:$0xff]  ;;  %v90_v18 = vld [vmem:[%s5186_s2 + $0x1d0] sm:$0xff] }
  0x4f   :  { %376 = vperm.xlu0 %3972, %v150_v19   ;;  %v4535_v19 = vpack.c.bf16 %v1187_v16, %v1186_v15 }
  0x51   :  { %3456 = vmatmul.mubr.msk.f32.gmra.mrb[30].mxu0 %vm544_vm0, %v63_v20  ;;  %v178_v20 = vld [vmem:[%s5184_s3 + $0x210] sm:$0xff]  ;;  %3795 = vmatprep.subr.bf16.mxu1 %v4535_v19 }
  0x52   :  { %391 = vperm.xlu1 %3973, %v153_v21   ;;  %3458 = vmatprep.mubr.msk.f32.mxu0 %vm544_vm0, %v64_v22  ;;  %v91_v21 = vld [vmem:[%s5186_s2 + $0x1d8] sm:$0xff]  ;;  %v181_v22 = vld [vmem:[%s5184_s3 + $0x228] sm:$0xff] }
  0x53   :  { %386 = vperm.xlu0 %3972, %v152_v23   ;;  %v92_v23 = vld [vmem:[%s5186_s2 + $0x1e0] sm:$0xff] }
  0x55   :  { %3459 = vmatmul.mubr.msk.f32.gmra.mrb[32].mxu0 %vm544_vm0, %v65_v24  ;;  %v180_v24 = vld [vmem:[%s5184_s3 + $0x220] sm:$0xff] }
  0x56   :  { %401 = vperm.xlu1 %3973, %v155_v25   ;;  %3461 = vmatprep.mubr.msk.f32.mxu0 %vm544_vm0, %v66_v26  ;;  %v93_v25 = vld [vmem:[%s5186_s2 + $0x1e8] sm:$0xff]  ;;  %v183_v26 = vld [vmem:[%s5184_s3 + $0x238] sm:$0xff] }
  0x57   :  { %396 = vperm.xlu0 %3972, %v154_v27   ;;  %v94_v27 = vld [vmem:[%s5186_s2 + $0x1f0] sm:$0xff] }
  0x59   :  { %3462 = vmatmul.mubr.msk.f32.gmra.mrb[34].mxu0 %vm544_vm0, %v67_v28  ;;  %v182_v28 = vld [vmem:[%s5184_s3 + $0x230] sm:$0xff] }
  0x5a   :  { %411 = vperm.xlu1 %3973, %v157_v29   ;;  %3464 = vmatprep.mubr.msk.f32.mxu0 %vm544_vm0, %v68_v30  ;;  %v95_v29 = vld [vmem:[%s5186_s2 + $0x1f8] sm:$0xff]  ;;  %v2457_v30 = vld [vmem:[%s5188_s6 + $0x8] sm:$0xff] }
  0x5b   :  { %406 = vperm.xlu0 %3972, %v156_v31   ;;  %v96_v31 = vld [vmem:[%s5186_s2 + $0x200] sm:$0xff] }
  0x5d   :  { %3465 = vmatmul.mubr.msk.f32.gmra.mrb[36].mxu0 %vm544_vm0, %v69_v32  ;;  %v2456_v32 = vld [vmem:[%s5188_s6] sm:$0xff] }
  0x5e   :  { %421 = vperm.xlu1 %3973, %v159_v33   ;;  %3467 = vmatprep.mubr.msk.f32.mxu0 %vm544_vm0, %v70_v34  ;;  %v97_v33 = vld [vmem:[%s5186_s2 + $0x208] sm:$0xff]  ;;  %v2459_v34 = vld [vmem:[%s5188_s6 + $0x18] sm:$0xff] }
  0x5f   :  { %416 = vperm.xlu0 %3972, %v158_v35   ;;  %v98_v35 = vld [vmem:[%s5186_s2 + $0x210] sm:$0xff] }
  0x61   :  { %3468 = vmatmul.mubr.msk.f32.gmra.mrb[38].mxu0 %vm544_vm0, %v71_v36  ;;  %v2458_v36 = vld [vmem:[%s5188_s6 + $0x10] sm:$0xff] }
  0x62   :  { %431 = vperm.xlu1 %3973, %v161_v37   ;;  %3470 = vmatprep.mubr.msk.f32.mxu0 %vm544_vm0, %v72_v38  ;;  %v99_v37 = vld [vmem:[%s5186_s2 + $0x218] sm:$0xff]  ;;  %v2461_v38 = vld [vmem:[%s5188_s6 + $0x28] sm:$0xff] }
  0x63   :  { %426 = vperm.xlu0 %3972, %v160_v39   ;;  %v100_v39 = vld [vmem:[%s5186_s2 + $0x220] sm:$0xff] }
  0x65   :  { %3471 = vmatmul.mubr.msk.f32.gmra.mrb[40].mxu0 %vm544_vm0, %v73_v40  ;;  %v2460_v40 = vld [vmem:[%s5188_s6 + $0x20] sm:$0xff] }
  0x66   :  { %441 = vperm.xlu1 %3973, %v163_v41   ;;  %3473 = vmatprep.mubr.msk.f32.mxu0 %vm544_vm0, %v74_v42  ;;  %v101_v41 = vld [vmem:[%s5186_s2 + $0x228] sm:$0xff]  ;;  %v2463_v42 = vld [vmem:[%s5188_s6 + $0x38] sm:$0xff] }
  0x67   :  { %436 = vperm.xlu0 %3972, %v162_v43   ;;  %v102_v43 = vld [vmem:[%s5186_s2 + $0x230] sm:$0xff] }
  0x69   :  { %3474 = vmatmul.mubr.msk.f32.gmra.mrb[42].mxu0 %vm544_vm0, %v75_v44  ;;  %v2462_v44 = vld [vmem:[%s5188_s6 + $0x30] sm:$0xff] }
  0x6a   :  { %451 = vperm.xlu1 %3973, %v165_v45   ;;  %3476 = vmatprep.mubr.msk.f32.mxu0 %vm544_vm0, %v76_v46  ;;  %v103_v45 = vld [vmem:[%s5186_s2 + $0x238] sm:$0xff]  ;;  %v2826_v46 = vld [vmem:[%s5189_s8 + $0x8] sm:$0xff] }
  0x6b   :  { %446 = vperm.xlu0 %3972, %v164_v47   ;;  %v2825_v47 = vld [vmem:[%s5189_s8] sm:$0xff] }
  0x6d   :  { %3477 = vmatmul.mubr.msk.f32.gmra.mrb[44].mxu0 %vm544_vm0, %v77_v48  ;;  %v2828_v48 = vld [vmem:[%s5189_s8 + $0x18] sm:$0xff] }
  0x6e   :  { %461 = vperm.xlu1 %3973, %v167_v49   ;;  %3479 = vmatprep.mubr.msk.f32.mxu0 %vm544_vm0, %v78_v50  ;;  %v2827_v49 = vld [vmem:[%s5189_s8 + $0x10] sm:$0xff]  ;;  %v2830_v50 = vld [vmem:[%s5189_s8 + $0x28] sm:$0xff] }
  0x6f   :  { %456 = vperm.xlu0 %3972, %v166_v51   ;;  %v2829_v51 = vld [vmem:[%s5189_s8 + $0x20] sm:$0xff] }
  0x71   :  { %3480 = vmatmul.mubr.msk.f32.gmra.mrb[46].mxu0 %vm544_vm0, %v79_v52  ;;  %v2832_v52 = vld [vmem:[%s5189_s8 + $0x38] sm:$0xff] }
  0x72   :  { %471 = vperm.xlu1 %3973, %v169_v53   ;;  %3482 = vmatprep.mubr.msk.f32.mxu0 %vm544_vm0, %v80_v54  ;;  %v2831_v53 = vld [vmem:[%s5189_s8 + $0x30] sm:$0xff] }
  0x73   :  { %466 = vperm.xlu0 %3972, %v168_v55  }
  0x75   :  { %3483 = vmatmul.mubr.msk.f32.gmra.mrb[48].mxu0 %vm544_vm0, %v81_v56 }
  0x76   :  { %481 = vperm.xlu1 %3973, %v171_v59   ;;  %3485 = vmatprep.mubr.msk.f32.mxu0 %vm544_vm0, %v82_v60 }
  0x77   :  { %476 = vperm.xlu0 %3972, %v170_v62  }
  0x79   :  { %3486 = vmatmul.mubr.msk.f32.gmra.mrb[50].mxu0 %vm544_vm0, %v83_v63 }
  0x7a   :  { %491 = vperm.xlu1 %3973, %v173_v2   ;;  %3488 = vmatprep.mubr.msk.f32.mxu0 %vm544_vm0, %v84_v3 }
  0x7b   :  { %486 = vperm.xlu0 %3972, %v172_v5  }
  0x7d   :  { %3489 = vmatmul.mubr.msk.f32.gmra.mrb[52].mxu0 %vm544_vm0, %v85_v6 }
  0x7e   :  { %501 = vperm.xlu1 %3973, %v175_v7   ;;  %3491 = vmatprep.mubr.msk.f32.mxu0 %vm544_vm0, %v86_v8 }
  0x7f   :  { %496 = vperm.xlu0 %3972, %v174_v9  }
  0x81   :  { %3492 = vmatmul.mubr.msk.f32.gmra.mrb[54].mxu0 %vm544_vm0, %v87_v10  ;;  %v227_v54 = vpop.permute.xlu0 %226  ;;  %v237_v55 = vpop.permute.xlu1 %236 }
  0x82   :  { %511 = vperm.xlu1 %3973, %v177_v11   ;;  %3494 = vmatprep.mubr.msk.f32.mxu0 %vm544_vm0, %v88_v12 }
  0x83   :  { %506 = vperm.xlu0 %3972, %v176_v13  }
  0x85   :  { %3495 = vmatmul.mubr.msk.f32.gmra.mrb[56].mxu0 %vm544_vm0, %v89_v14  ;;  %v242_v57 = vpop.permute.xlu1 %241 }
  0x86   :  { %521 = vperm.xlu1 %3973, %v179_v17   ;;  %3497 = vmatprep.mubr.msk.f32.mxu0 %vm544_vm0, %v90_v18  ;;  %v232_v56 = vpop.permute.xlu0 %231 }
  0x87   :  { %516 = vperm.xlu0 %3972, %v178_v20  }
  0x89   :  { %3498 = vmatmul.mubr.msk.f32.gmra.mrb[58].mxu0 %vm544_vm0, %v91_v21  ;;  %v252_v59 = vpop.permute.xlu1 %251 }
  0x8a   :  { %531 = vperm.xlu1 %3973, %v181_v22   ;;  %3500 = vmatprep.mubr.msk.f32.mxu0 %vm544_vm0, %v92_v23  ;;  %v247_v58 = vpop.permute.xlu0 %246 }
  0x8b   :  { %526 = vperm.xlu0 %3972, %v180_v24   ;;  %v1188_v24 = vld [vmem:[%s5187_s4 + $0x10] sm:$0xff] }
  0x8d   :  { %3501 = vmatmul.mubr.msk.f32.gmra.mrb[60].mxu0 %vm544_vm0, %v93_v25  ;;  %v262_v61 = vpop.permute.xlu1 %261  ;;  %v1189_v25 = vld [vmem:[%s5187_s4 + $0x18] sm:$0xff] }
  0x8e   :  { %541 = vperm.xlu1 %3973, %v183_v26   ;;  %3503 = vmatprep.mubr.msk.f32.mxu0 %vm544_vm0, %v94_v27  ;;  %v257_v60 = vpop.permute.xlu0 %256 }
  0x8f   :  { %536 = vperm.xlu0 %3972, %v182_v28  }
  0x91   :  { %3504 = vmatmul.mubr.msk.f32.gmra.mrb[62].mxu0 %vm544_vm0, %v95_v29  ;;  %v4657_v63 = vpop.permute.xlu1 %191 }
  0x92   :  { %2471 = vperm.xlu1 %3973, %v2457_v30   ;;  %3506 = vmatprep.mubr.msk.f32.mxu0 %vm544_vm0, %v96_v31  ;;  %v4655_v62 = vpop.permute.xlu0 %186  ;;  %v3798_v30 = vpack.c.bf16 %v1189_v25, %v1188_v24 }
  0x93   :  { %2466 = vperm.xlu0 %3972, %v2456_v32  }
  0x95   :  { %3507 = vmatmul.mubr.msk.f32.gmra.mrb[64].mxu0 %vm544_vm0, %v97_v33  ;;  %v4661_v1 = vpop.permute.xlu1 %201  ;;  %v1453_v33 = vld [vmem:[%s5187_s4 + $0x40] sm:$0xff] }
  0x96   :  { %2481 = vperm.xlu1 %3973, %v2459_v34   ;;  %3509 = vmatprep.mubr.msk.f32.mxu0 %vm544_vm0, %v98_v35  ;;  %v4659_v0 = vpop.permute.xlu0 %196  ;;  %v1454_v34 = vld [vmem:[%s5187_s4 + $0x48] sm:$0xff] }
  0x97   :  { %2476 = vperm.xlu0 %3972, %v2458_v36  }
  0x99   :  { %3510 = vmatmul.mubr.msk.f32.gmra.mrb[66].mxu0 %vm544_vm0, %v99_v37  ;;  %v4665_v3 = vpop.permute.xlu1 %211 }
  0x9a   :  { %2491 = vperm.xlu1 %3973, %v2461_v38   ;;  %3512 = vmatprep.mubr.msk.f32.mxu0 %vm544_vm0, %v100_v39  ;;  %v4663_v2 = vpop.permute.xlu0 %206  ;;  %v3802_v39 = vpack.c.bf16 %v1454_v34, %v1453_v33  ;;  %v1735_v33 = vld [vmem:[%s5187_s4 + $0x80] sm:$0xff]  ;;  %v1736_v34 = vld [vmem:[%s5187_s4 + $0x88] sm:$0xff] }
  0x9b   :  { %2486 = vperm.xlu0 %3972, %v2460_v40  }
  0x9d   :  { %3513 = vmatmul.mubr.msk.f32.gmra.mrb[68].mxu0 %vm544_vm0, %v101_v41  ;;  %v4669_v5 = vpop.permute.xlu1 %221 }
  0x9e   :  { %2501 = vperm.xlu1 %3973, %v2463_v42   ;;  %3515 = vmatprep.mubr.msk.f32.mxu0 %vm544_vm0, %v102_v43  ;;  %v4667_v4 = vpop.permute.xlu0 %216 }
  0x9f   :  { %2496 = vperm.xlu0 %3972, %v2462_v44  }
  0xa1   :  { %3516 = vmatmul.mubr.msk.f32.gmra.mrb[70].mxu0 %vm544_vm0, %v103_v45  ;;  %v4673_v7 = vpop.permute.xlu1 %271 }
  0xa2   :  { %2840 = vperm.xlu1 %3973, %v2826_v46   ;;  %v4671_v6 = vpop.permute.xlu0 %266 }
  0xa3   :  { %2835 = vperm.xlu0 %3972, %v2825_v47  }
  0xa5   :  { %v4677_v11 = vpop.permute.xlu1 %281 }
  0xa6   :  { %2850 = vperm.xlu1 %3973, %v2828_v48   ;;  %v4675_v8 = vpop.permute.xlu0 %276 }
  0xa7   :  { %2845 = vperm.xlu0 %3972, %v2827_v49  }
  0xa9   :  { %v4683_v15 = vpop.permute.xlu1 %291 }
  0xaa   :  { %2860 = vperm.xlu1 %3973, %v2830_v50   ;;  %v4681_v13 = vpop.permute.xlu0 %286 }
  0xab   :  { %2855 = vperm.xlu0 %3972, %v2829_v51  }
  0xad   :  { %v4695_v22 = vpop.permute.xlu1 %301 }
  0xae   :  { %2870 = vperm.xlu1 %3973, %v2832_v52   ;;  %v4689_v18 = vpop.permute.xlu0 %296  ;;  %v1455_v52 = vld [vmem:[%s5187_s4 + $0x50] sm:$0xff] }
  0xaf   :  { %2865 = vperm.xlu0 %3972, %v2831_v53   ;;  %v1456_v53 = vld [vmem:[%s5187_s4 + $0x58] sm:$0xff] }
  0xb1   :  { %v4705_v31 = vpop.permute.xlu1 %311 }
  0xb2   :  { %v4703_v26 = vpop.permute.xlu0 %306 }
  0xb5   :  { %v4720_v42 = vpop.permute.xlu1 %321 }
  0xb6   :  { %v4716_v37 = vpop.permute.xlu0 %316 }
  0xb9   :  { %v4726_v49 = vpop.permute.xlu1 %331 }
  0xe8   :  { %v3412_v9 = vpop.f32.mrb[0].mxu0 }
  0xe9   :  { %v827_v10 = vpop.f32.mrb[1].mxu0 }
  0xea   :  { %v828_v50 = vadd.f32 %v827_v10, %v4655_v62  ;;  %v4749_v10 = vpop.permute.xlu1 %341 }
  0xec   :  { %v4679_v12 = vpop.f32.mrb[2].mxu0 }
  0xed   :  { %v837_v14 = vpop.f32.mrb[3].mxu0 }
  0xf0   :  { %v4685_v16 = vpop.f32.mrb[4].mxu0 }
  0xf1   :  { %v4687_v17 = vpop.f32.mrb[5].mxu0  ;;  %v853_v25 = vadd.f32 %v4685_v16, %v4665_v3  ;;  %v1596_v16 = vld [vmem:[%s5187_s4 + $0x70] sm:$0xff] }
  0xf4   :  { %v4691_v20 = vpop.f32.mrb[6].mxu0 }
  0xf5   :  { %v4693_v21 = vpop.f32.mrb[7].mxu0 }
  0xf8   :  { %v3424_v23 = vpop.f32.mrb[8].mxu0 }
  0xf9   :  { %v867_v27 = vpop.f32.mrb[9].mxu0  ;;  %v873_v29 = vadd.f32 %v3424_v23, %v232_v56  ;;  %v833_v56 = vadd.f32 %v3412_v9, %v4657_v63  ;;  %v843_v63 = vadd.f32 %v4679_v12, %v4661_v1  ;;  %v848_v9 = vadd.f32 %v4687_v17, %v4663_v2 }
  0xfa   :  { %v868_v28 = vadd.f32 %v867_v27, %v227_v54  ;;  %v4762_v27 = vpop.permute.xlu1 %351  ;;  %v858_v1 = vadd.f32 %v4693_v21, %v4667_v4  ;;  %v1597_v4 = vld [vmem:[%s5187_s4 + $0x78] sm:$0xff] }
  0xfc   :  { %v3427_v32 = vpop.f32.mrb[10].mxu0  ;;  %3526 = vmatprep.mubr.msk.f32.mxu1 %vm1194_vm1, %v868_v28  ;;  %v863_v28 = vadd.f32 %v4691_v20, %v4669_v5  ;;  %v3814_v20 = vpack.c.bf16 %v1597_v4, %v1596_v16  ;;  %v2017_v4 = vld [vmem:[%s5187_s4 + $0xc0] sm:$0xff] }
  0xfd   :  { %v877_v35 = vpop.f32.mrb[11].mxu0  ;;  %3527 = vmatmul.mubr.msk.f32.vlgmr.msra.gmra.mrb[0].mxu1 %vm1194_vm1, %v873_v29  ;;  %v883_v38 = vadd.f32 %v3427_v32, %v242_v57  ;;  %v3806_v57 = vpack.c.bf16 %v1456_v53, %v1455_v52 }
  0xfe   :  { %v878_v36 = vadd.f32 %v877_v35, %v237_v55  ;;  %3797 = vmatpush3.bf16.msra.mxu1 %v4535_v19  ;;  %v4723_v19 = vpop.permute.xlu0 %326 }
  0xff   :  { %3799 = vmatprep.subr.bf16.mxu1 %v3798_v30 }
 0x100   :  { %v3430_v40 = vpop.f32.mrb[12].mxu0  ;;  %3529 = vmatprep.mubr.msk.f32.mxu1 %vm1194_vm1, %v878_v36 }
 0x101   :  { %v887_v41 = vpop.f32.mrb[13].mxu0  ;;  %3530 = vmatmul.mubr.msk.f32.gmra.mrb[2].mxu1 %vm1194_vm1, %v883_v38  ;;  %v893_v44 = vadd.f32 %v3430_v40, %v252_v59 }
 0x102   :  { %v888_v43 = vadd.f32 %v887_v41, %v247_v58  ;;  %3801 = vmatpush3.bf16.msra.mxu1 %v3798_v30  ;;  %v4738_v55 = vpop.permute.xlu0 %336  ;;  %v838_v58 = vadd.f32 %v837_v14, %v4659_v0  ;;  %v4780_v30 = vpop.permute.xlu1 %361 }
 0x103   :  { %3803 = vmatprep.subr.bf16.mxu1 %v3802_v39 }
 0x104   :  { %v3433_v45 = vpop.f32.mrb[14].mxu0  ;;  %3532 = vmatprep.mubr.msk.f32.mxu1 %vm1194_vm1, %v888_v43 }
 0x105   :  { %v897_v46 = vpop.f32.mrb[15].mxu0  ;;  %3533 = vmatmul.mubr.msk.f32.gmra.mrb[4].mxu1 %vm1194_vm1, %v893_v44  ;;  %v903_v48 = vadd.f32 %v3433_v45, %v262_v61  ;;  %v1595_v61 = vld [vmem:[%s5187_s4 + $0x68] sm:$0xff] }
 0x106   :  { %v898_v47 = vadd.f32 %v897_v46, %v257_v60  ;;  %v1594_v60 = vld [vmem:[%s5187_s4 + $0x60] sm:$0xff]  ;;  %v4756_v23 = vpop.permute.xlu0 %346  ;;  %v4796_v38 = vpop.permute.xlu1 %371 }
 0x107   :  { %v3810_v0 = vpack.c.bf16 %v1595_v61, %v1594_v60 }
 0x108   :  { %v3436_v51 = vpop.f32.mrb[16].mxu0  ;;  %3535 = vmatprep.mubr.msk.f32.mxu1 %vm1194_vm1, %v898_v47 }
 0x109   :  { %v907_v54 = vpop.f32.mrb[17].mxu0  ;;  %3536 = vmatmul.mubr.msk.f32.gmra.mrb[6].mxu1 %vm1194_vm1, %v903_v48  ;;  %v913_v5 = vadd.f32 %v3436_v51, %v4673_v7 }
 0x10a   :  { %3546 = vmatprep.mubr.msk.f32.mxu1 %vm1194_vm1, %v828_v50  ;;  %v4768_v17 = vpop.permute.xlu0 %356  ;;  %v908_v29 = vadd.f32 %v907_v54, %v4671_v6  ;;  %v4806_v47 = vpop.permute.xlu1 %381 }
 0x10c   :  { %v3439_v59 = vpop.f32.mrb[18].mxu0 }
 0x10d   :  { %v917_v62 = vpop.f32.mrb[19].mxu0  ;;  %3547 = vmatmul.mubr.msk.f32.vlgmr.msra.gmra.mrb[0].mxu1 %vm1194_vm1, %v833_v56  ;;  %v923_v7 = vadd.f32 %v3439_v59, %v4677_v11 }
 0x10e   :  { %3549 = vmatprep.mubr.msk.f32.mxu1 %vm1194_vm1, %v838_v58  ;;  %3805 = vmatpush3.bf16.msra.mxu1 %v3802_v39  ;;  %v918_v6 = vadd.f32 %v917_v62, %v4675_v8  ;;  %v4791_v35 = vpop.permute.xlu0 %366  ;;  %v3818_v8 = vpack.c.bf16 %v1736_v34, %v1735_v33  ;;  %v1877_v58 = vld [vmem:[%s5187_s4 + $0xa8] sm:$0xff] }
 0x10f   :  { %3807 = vmatprep.subr.bf16.mxu1 %v3806_v57 }
 0x110   :  { %v3442_v14 = vpop.f32.mrb[20].mxu0 }
 0x111   :  { %v927_v24 = vpop.f32.mrb[21].mxu0  ;;  %3550 = vmatmul.mubr.msk.f32.gmra.mrb[2].mxu1 %vm1194_vm1, %v843_v63  ;;  %v933_v44 = vadd.f32 %v3442_v14, %v4683_v15  ;;  %v1737_v15 = vld [vmem:[%s5187_s4 + $0x90] sm:$0xff] }
 0x112   :  { %3552 = vmatprep.mubr.msk.f32.mxu1 %vm1194_vm1, %v848_v9  ;;  %3809 = vmatpush3.bf16.msra.mxu1 %v3806_v57  ;;  %v928_v39 = vadd.f32 %v927_v24, %v4681_v13  ;;  %v4801_v43 = vpop.permute.xlu0 %376  ;;  %v1876_v57 = vld [vmem:[%s5187_s4 + $0xa0] sm:$0xff] }
 0x113   :  { %3811 = vmatprep.subr.bf16.mxu1 %v3810_v0 }
 0x114   :  { %v3445_v12 = vpop.f32.mrb[22].mxu0 }
 0x115   :  { %v937_v2 = vpop.f32.mrb[23].mxu0  ;;  %3553 = vmatmul.mubr.msk.f32.gmra.mrb[4].mxu1 %vm1194_vm1, %v853_v25  ;;  %v943_v13 = vadd.f32 %v3445_v12, %v4695_v22 }
 0x116   :  { %3555 = vmatprep.mubr.msk.f32.mxu1 %vm1194_vm1, %v858_v1  ;;  %v938_v11 = vadd.f32 %v937_v2, %v4689_v18  ;;  %v1738_v18 = vld [vmem:[%s5187_s4 + $0x98] sm:$0xff]  ;;  %v4817_v51 = vpop.permute.xlu0 %386 }
 0x117   :  { %v3822_v53 = vpack.c.bf16 %v1738_v18, %v1737_v15  ;;  %v2159_v15 = vld [vmem:[%s5187_s4 + $0xe8] sm:$0xff] }
 0x118   :  { %v3448_v3 = vpop.f32.mrb[24].mxu0 }
 0x119   :  { %v947_v21 = vpop.f32.mrb[25].mxu0  ;;  %3556 = vmatmul.mubr.msk.f32.gmra.mrb[6].mxu1 %vm1194_vm1, %v863_v28  ;;  %v953_v22 = vadd.f32 %v3448_v3, %v4705_v31 }
 0x11a   :  { %3566 = vmatprep.mubr.msk.f32.mxu1 %vm1194_vm1, %v908_v29  ;;  %v948_v48 = vadd.f32 %v947_v21, %v4703_v26  ;;  %v4822_v26 = vpop.permute.xlu1 %391  ;;  %v4833_v31 = vpop.permute.xlu0 %396  ;;  %v2018_v21 = vld [vmem:[%s5187_s4 + $0xc8] sm:$0xff] }
 0x11c   :  { %v3451_v32 = vpop.f32.mrb[26].mxu0 }
 0x11d   :  { %v957_v36 = vpop.f32.mrb[27].mxu0  ;;  %3567 = vmatmul.mubr.msk.f32.vlgmr.msra.gmra.mrb[0].mxu1 %vm1194_vm1, %v913_v5  ;;  %v963_v60 = vadd.f32 %v3451_v32, %v4720_v42 }
 0x11e   :  { %3569 = vmatprep.mubr.msk.f32.mxu1 %vm1194_vm1, %v918_v6  ;;  %3813 = vmatpush3.bf16.msra.mxu1 %v3810_v0  ;;  %v958_v54 = vadd.f32 %v957_v36, %v4716_v37  ;;  %v3826_v37 = vpack.c.bf16 %v1877_v58, %v1876_v57  ;;  %v4838_v0 = vpop.permute.xlu1 %401  ;;  %v4843_v42 = vpop.permute.xlu0 %406 }
 0x11f   :  { %3815 = vmatprep.subr.bf16.mxu1 %v3814_v20 }
 0x120   :  { %v3454_v40 = vpop.f32.mrb[28].mxu0 }
 0x121   :  { %v967_v41 = vpop.f32.mrb[29].mxu0  ;;  %3570 = vmatmul.mubr.msk.f32.gmra.mrb[2].mxu1 %vm1194_vm1, %v923_v7  ;;  %v973_v9 = vadd.f32 %v3454_v40, %v4726_v49  ;;  %v1878_v49 = vld [vmem:[%s5187_s4 + $0xb0] sm:$0xff] }
 0x122   :  { %3572 = vmatprep.mubr.msk.f32.mxu1 %vm1194_vm1, %v928_v39  ;;  %3817 = vmatpush3.bf16.msra.mxu1 %v3814_v20  ;;  %v968_v61 = vadd.f32 %v967_v41, %v4723_v19  ;;  %v4848_v1 = vpop.permute.xlu1 %411  ;;  %v4859_v29 = vpop.permute.xlu0 %416 }
 0x123   :  { %3819 = vmatprep.subr.bf16.mxu1 %v3818_v8 }
 0x124   :  { %v3457_v45 = vpop.f32.mrb[30].mxu0 }
 0x125   :  { %v977_v46 = vpop.f32.mrb[31].mxu0  ;;  %3573 = vmatmul.mubr.msk.f32.gmra.mrb[4].mxu1 %vm1194_vm1, %v933_v44  ;;  %v983_v19 = vadd.f32 %v3457_v45, %v4749_v10 }
 0x126   :  { %3575 = vmatprep.mubr.msk.f32.mxu1 %vm1194_vm1, %v938_v11  ;;  %v978_v14 = vadd.f32 %v977_v46, %v4738_v55  ;;  %v1879_v55 = vld [vmem:[%s5187_s4 + $0xb8] sm:$0xff]  ;;  %v422_v20 = vpop.permute.xlu1 %421  ;;  %v427_v33 = vpop.permute.xlu0 %426 }
 0x127   :  { %v3830_v3 = vpack.c.bf16 %v1879_v55, %v1878_v49  ;;  %v2300_v49 = vld [vmem:[%s5187_s4 + $0x108] sm:$0xff] }
 0x128   :  { %v3460_v50 = vpop.f32.mrb[32].mxu0 }
 0x129   :  { %v987_v52 = vpop.f32.mrb[33].mxu0  ;;  %3576 = vmatmul.mubr.msk.f32.gmra.mrb[6].mxu1 %vm1194_vm1, %v943_v13  ;;  %v993_v10 = vadd.f32 %v3460_v50, %v4762_v27  ;;  %v2158_v50 = vld [vmem:[%s5187_s4 + $0xe0] sm:$0xff] }
 0x12a   :  { %3586 = vmatprep.mubr.msk.f32.mxu1 %vm1194_vm1, %v948_v48  ;;  %v988_v12 = vadd.f32 %v987_v52, %v4756_v23  ;;  %v432_v7 = vpop.permute.xlu1 %431 }
 0x12c   :  { %v3463_v56 = vpop.f32.mrb[34].mxu0 }
 0x12d   :  { %v997_v59 = vpop.f32.mrb[35].mxu0  ;;  %3587 = vmatmul.mubr.msk.f32.vlgmr.msra.gmra.mrb[0].mxu1 %vm1194_vm1, %v953_v22  ;;  %v1003_v27 = vadd.f32 %v3463_v56, %v4780_v30  ;;  %v3842_v22 = vpack.c.bf16 %v2159_v15, %v2158_v50 }
 0x12e   :  { %3589 = vmatprep.mubr.msk.f32.mxu1 %vm1194_vm1, %v958_v54  ;;  %3821 = vmatpush3.bf16.msra.mxu1 %v3818_v8  ;;  %v998_v23 = vadd.f32 %v997_v59, %v4768_v17  ;;  %v3834_v17 = vpack.c.bf16 %v2018_v21, %v2017_v4  ;;  %v442_v45 = vpop.permute.xlu1 %441 }
 0x12f   :  { %3823 = vmatprep.subr.bf16.mxu1 %v3822_v53 }
 0x130   :  { %v3466_v62 = vpop.f32.mrb[36].mxu0 }
 0x131   :  { %v1007_v63 = vpop.f32.mrb[37].mxu0  ;;  %3590 = vmatmul.mubr.msk.f32.gmra.mrb[2].mxu1 %vm1194_vm1, %v963_v60  ;;  %v1013_v36 = vadd.f32 %v3466_v62, %v4796_v38  ;;  %v2019_v38 = vld [vmem:[%s5187_s4 + $0xd0] sm:$0xff] }
 0x132   :  { %3592 = vmatprep.mubr.msk.f32.mxu1 %vm1194_vm1, %v968_v61  ;;  %3825 = vmatpush3.bf16.msra.mxu1 %v3822_v53  ;;  %v1008_v6 = vadd.f32 %v1007_v63, %v4791_v35  ;;  %v437_v35 = vpop.permute.xlu0 %436  ;;  %v452_v53 = vpop.permute.xlu1 %451 }
 0x133   :  { %3827 = vmatprep.subr.bf16.mxu1 %v3826_v37 }
 0x134   :  { %v3469_v24 = vpop.f32.mrb[38].mxu0 }
 0x135   :  { %v1017_v25 = vpop.f32.mrb[39].mxu0  ;;  %3593 = vmatmul.mubr.msk.f32.gmra.mrb[4].mxu1 %vm1194_vm1, %v973_v9  ;;  %v1023_v40 = vadd.f32 %v3469_v24, %v4806_v47  ;;  %v2161_v9 = vld [vmem:[%s5187_s4 + $0xf8] sm:$0xff] }
 0x136   :  { %3595 = vmatprep.mubr.msk.f32.mxu1 %vm1194_vm1, %v978_v14  ;;  %v1018_v8 = vadd.f32 %v1017_v25, %v4801_v43  ;;  %v2020_v43 = vld [vmem:[%s5187_s4 + $0xd8] sm:$0xff]  ;;  %v447_v18 = vpop.permute.xlu0 %446 }
 0x137   :  { %v3838_v47 = vpack.c.bf16 %v2020_v43, %v2019_v38 }
 0x138   :  { %v3472_v2 = vpop.f32.mrb[40].mxu0 }
 0x139   :  { %v1027_v28 = vpop.f32.mrb[41].mxu0  ;;  %3596 = vmatmul.mubr.msk.f32.gmra.mrb[6].mxu1 %vm1194_vm1, %v983_v19  ;;  %v1033_v46 = vadd.f32 %v3472_v2, %v4822_v26  ;;  %v2299_v2 = vld [vmem:[%s5187_s4 + $0x100] sm:$0xff] }
 0x13a   :  { %3606 = vmatprep.mubr.msk.f32.mxu1 %vm1194_vm1, %v988_v12  ;;  %v1028_v41 = vadd.f32 %v1027_v28, %v4817_v51  ;;  %v457_v57 = vpop.permute.xlu0 %456 }
 0x13c   :  { %v3475_v16 = vpop.f32.mrb[42].mxu0 }
 0x13d   :  { %v1037_v5 = vpop.f32.mrb[43].mxu0  ;;  %3607 = vmatmul.mubr.msk.f32.vlgmr.msra.gmra.mrb[0].mxu1 %vm1194_vm1, %v993_v10  ;;  %v1043_v52 = vadd.f32 %v3475_v16, %v4838_v0  ;;  %v2160_v0 = vld [vmem:[%s5187_s4 + $0xf0] sm:$0xff]  ;;  %v3850_v10 = vpack.c.bf16 %v2300_v49, %v2299_v2  ;;  %v2440_v2 = vld [vmem:[%s5191_s1] sm:$0xff]  ;;  %v2441_v49 = vld [vmem:[%s5191_s1 + $0x8] sm:$0xff] }
 0x13e   :  { %3609 = vmatprep.mubr.msk.f32.mxu1 %vm1194_vm1, %v998_v23  ;;  %3829 = vmatpush3.bf16.msra.mxu1 %v3826_v37  ;;  %v1038_v13 = vadd.f32 %v1037_v5, %v4833_v31  ;;  %v462_v37 = vpop.permute.xlu1 %461  ;;  %v467_v14 = vpop.permute.xlu0 %466  ;;  %v3846_v25 = vpack.c.bf16 %v2161_v9, %v2160_v0 }
 0x13f   :  { %3831 = vmatprep.subr.bf16.mxu1 %v3830_v3 }
 0x140   :  { %v3478_v32 = vpop.f32.mrb[44].mxu0 }
 0x141   :  { %v1047_v34 = vpop.f32.mrb[45].mxu0  ;;  %3610 = vmatmul.mubr.msk.f32.gmra.mrb[2].mxu1 %vm1194_vm1, %v1003_v27  ;;  %v1053_v58 = vadd.f32 %v3478_v32, %v4848_v1 }
 0x142   :  { %3612 = vmatprep.mubr.msk.f32.mxu1 %vm1194_vm1, %v1008_v6  ;;  %3833 = vmatpush3.bf16.msra.mxu1 %v3830_v3  ;;  %v1048_v26 = vadd.f32 %v1047_v34, %v4843_v42  ;;  %v472_v19 = vpop.permute.xlu1 %471  ;;  %v477_v28 = vpop.permute.xlu0 %476 }
 0x143   :  { %3835 = vmatprep.subr.bf16.mxu1 %v3834_v17 }
 0x144   :  { %v3481_v39 = vpop.f32.mrb[46].mxu0 }
 0x145   :  { %v1057_v30 = vpop.f32.mrb[47].mxu0  ;;  %3613 = vmatmul.mubr.msk.f32.gmra.mrb[4].mxu1 %vm1194_vm1, %v1013_v36  ;;  %v1063_v61 = vadd.f32 %v3481_v39, %v422_v20  ;;  %v2301_v36 = vld [vmem:[%s5187_s4 + $0x110] sm:$0xff] }
 0x146   :  { %3615 = vmatprep.mubr.msk.f32.mxu1 %vm1194_vm1, %v1018_v8  ;;  %v1058_v59 = vadd.f32 %v1057_v30, %v4859_v29  ;;  %v482_v4 = vpop.permute.xlu1 %481  ;;  %v487_v27 = vpop.permute.xlu0 %486 }
 0x148   :  { %v3484_v44 = vpop.f32.mrb[48].mxu0 }
 0x149   :  { %v1067_v11 = vpop.f32.mrb[49].mxu0  ;;  %3616 = vmatmul.mubr.msk.f32.gmra.mrb[6].mxu1 %vm1194_vm1, %v1023_v40  ;;  %v1073_v42 = vadd.f32 %v3484_v44, %v432_v7  ;;  %v2302_v7 = vld [vmem:[%s5187_s4 + $0x118] sm:$0xff] }
 0x14a   :  { %3626 = vmatprep.mubr.msk.f32.mxu1 %vm1194_vm1, %v1028_v41  ;;  %v1068_v62 = vadd.f32 %v1067_v11, %v427_v33  ;;  %v492_v32 = vpop.permute.xlu1 %491  ;;  %v497_v39 = vpop.permute.xlu0 %496 }
 0x14c   :  { %v3487_v48 = vpop.f32.mrb[50].mxu0 }
 0x14d   :  { %v1077_v51 = vpop.f32.mrb[51].mxu0  ;;  %3627 = vmatmul.mubr.msk.f32.vlgmr.msra.gmra.mrb[0].mxu1 %vm1194_vm1, %v1033_v46  ;;  %v1083_v29 = vadd.f32 %v3487_v48, %v442_v45 }
 0x14e   :  { %3629 = vmatprep.mubr.msk.f32.mxu1 %vm1194_vm1, %v1038_v13  ;;  %3837 = vmatpush3.bf16.msra.mxu1 %v3834_v17  ;;  %v1078_v1 = vadd.f32 %v1077_v51, %v437_v35  ;;  %v3854_v35 = vpack.c.bf16 %v2302_v7, %v2301_v36  ;;  %v502_v38 = vpop.permute.xlu1 %501  ;;  %v507_v46 = vpop.permute.xlu0 %506  ;;  %v2453_v36 = vld [vmem:[%s5190_s5 + $0x28] sm:$0xff]  ;;  %v2454_v7 = vld [vmem:[%s5190_s5 + $0x30] sm:$0xff] }
 0x14f   :  { %3839 = vmatprep.subr.bf16.mxu1 %v3838_v47 }
 0x150   :  { %v3490_v54 = vpop.f32.mrb[52].mxu0 }
 0x151   :  { %v1087_v56 = vpop.f32.mrb[53].mxu0  ;;  %3630 = vmatmul.mubr.msk.f32.gmra.mrb[2].mxu1 %vm1194_vm1, %v1043_v52  ;;  %v1093_v21 = vadd.f32 %v3490_v54, %v452_v53 }
 0x152   :  { %3632 = vmatprep.mubr.msk.f32.mxu1 %vm1194_vm1, %v1048_v26  ;;  %3841 = vmatpush3.bf16.msra.mxu1 %v3838_v47  ;;  %v1088_v3 = vadd.f32 %v1087_v56, %v447_v18  ;;  %v512_v48 = vpop.permute.xlu1 %511  ;;  %v517_v51 = vpop.permute.xlu0 %516 }
 0x153   :  { %3843 = vmatprep.subr.bf16.mxu1 %v3842_v22 }
 0x154   :  { %v3493_v31 = vpop.f32.mrb[54].mxu0 }
 0x155   :  { %v1097_v60 = vpop.f32.mrb[55].mxu0  ;;  %3633 = vmatmul.mubr.msk.f32.gmra.mrb[4].mxu1 %vm1194_vm1, %v1053_v58  ;;  %v1103_v6 = vadd.f32 %v3493_v31, %v462_v37 }
 0x156   :  { %3635 = vmatprep.mubr.msk.f32.mxu1 %vm1194_vm1, %v1058_v59  ;;  %v1098_v5 = vadd.f32 %v1097_v60, %v457_v57  ;;  %v522_v53 = vpop.permute.xlu1 %521  ;;  %v527_v56 = vpop.permute.xlu0 %526 }
 0x158   :  { %v3496_v63 = vpop.f32.mrb[56].mxu0 }
 0x159   :  { %v1107_v24 = vpop.f32.mrb[57].mxu0  ;;  %3636 = vmatmul.mubr.msk.f32.gmra.mrb[6].mxu1 %vm1194_vm1, %v1063_v61  ;;  %v1113_v30 = vadd.f32 %v3496_v63, %v472_v19  ;;  %v2448_v63 = vld [vmem:[%s5190_s5] sm:$0xff] }
 0x15a   :  { %3646 = vmatprep.mubr.msk.f32.mxu1 %vm1194_vm1, %v1068_v62  ;;  %v1108_v33 = vadd.f32 %v1107_v24, %v467_v14  ;;  %v532_v58 = vpop.permute.xlu1 %531  ;;  %v537_v31 = vpop.permute.xlu0 %536  ;;  %3730 = vmatprep.mubr.f32.mxu0 %v2448_v63 }
 0x15c   :  { %v3499_v12 = vpop.f32.mrb[58].mxu0 }
 0x15d   :  { %v1117_v55 = vpop.f32.mrb[59].mxu0  ;;  %3647 = vmatmul.mubr.msk.f32.vlgmr.msra.gmra.mrb[0].mxu1 %vm1194_vm1, %v1073_v42  ;;  %v1123_v43 = vadd.f32 %v3499_v12, %v482_v4  ;;  %v2444_v4 = vld [vmem:[%s5191_s1 + $0x20] sm:$0xff] }
 0x15e   :  { %3649 = vmatprep.mubr.msk.f32.mxu1 %vm1194_vm1, %v1078_v1  ;;  %3845 = vmatpush3.bf16.msra.mxu1 %v3842_v22  ;;  %v1118_v40 = vadd.f32 %v1117_v55, %v477_v28  ;;  %v542_v61 = vpop.permute.xlu1 %541 }
 0x15f   :  { %3847 = vmatprep.subr.bf16.mxu1 %v3846_v25 }
 0x160   :  { %v3502_v23 = vpop.f32.mrb[60].mxu0 }
 0x161   :  { %v1127_v16 = vpop.f32.mrb[61].mxu0  ;;  %3650 = vmatmul.mubr.msk.f32.gmra.mrb[2].mxu1 %vm1194_vm1, %v1083_v29  ;;  %v1133_v13 = vadd.f32 %v3502_v23, %v492_v32  ;;  %v2443_v23 = vld [vmem:[%s5191_s1 + $0x18] sm:$0xff]  ;;  %v2450_v32 = vld [vmem:[%s5190_s5 + $0x10] sm:$0xff] }
 0x162   :  { %3652 = vmatprep.mubr.msk.f32.mxu1 %vm1194_vm1, %v1088_v3  ;;  %3849 = vmatpush3.bf16.msra.mxu1 %v3846_v25  ;;  %v1128_v11 = vadd.f32 %v1127_v16, %v487_v27  ;;  %v2442_v3 = vld [vmem:[%s5191_s1 + $0x10] sm:$0xff]  ;;  %v2447_v27 = vld [vmem:[%s5191_s1 + $0x38] sm:$0xff] }
 0x163   :  { %3851 = vmatprep.subr.bf16.mxu1 %v3850_v10  ;;  %v3878_v16 = vpack.c.bf16 %v2443_v23, %v2442_v3 }
 0x164   :  { %v3505_v20 = vpop.f32.mrb[62].mxu0 }
 0x165   :  { %v1137_v17 = vpop.f32.mrb[63].mxu0  ;;  %3653 = vmatmul.mubr.msk.f32.gmra.mrb[4].mxu1 %vm1194_vm1, %v1093_v21  ;;  %v1143_v52 = vadd.f32 %v3505_v20, %v502_v38  ;;  %v2445_v21 = vld [vmem:[%s5191_s1 + $0x28] sm:$0xff]  ;;  %v2446_v20 = vld [vmem:[%s5191_s1 + $0x30] sm:$0xff] }
 0x166   :  { %3655 = vmatprep.mubr.msk.f32.mxu1 %vm1194_vm1, %v1098_v5  ;;  %v1138_v50 = vadd.f32 %v1137_v17, %v497_v39  ;;  %v3882_v5 = vpack.c.bf16 %v2445_v21, %v2444_v4  ;;  %v3886_v17 = vpack.c.bf16 %v2447_v27, %v2446_v20  ;;  %v2817_v39 = vld [vmem:[%s5192_s7] sm:$0xff] }
 0x168   :  { %v3508_v34 = vpop.f32.mrb[64].mxu0 }
 0x169   :  { %v1147_v8 = vpop.f32.mrb[65].mxu0  ;;  %3656 = vmatmul.mubr.msk.f32.gmra.mrb[6].mxu1 %vm1194_vm1, %v1103_v6  ;;  %v1153_v26 = vadd.f32 %v3508_v34, %v512_v48  ;;  %v2449_v6 = vld [vmem:[%s5190_s5 + $0x8] sm:$0xff]  ;;  %v2452_v34 = vld [vmem:[%s5190_s5 + $0x20] sm:$0xff] }
 0x16a   :  { %3666 = vmatprep.mubr.msk.f32.mxu1 %vm1194_vm1, %v1108_v33  ;;  %v1148_v22 = vadd.f32 %v1147_v8, %v507_v46  ;;  %v2451_v33 = vld [vmem:[%s5190_s5 + $0x18] sm:$0xff] }
 0x16b   :  { %v2455_v8 = vld [vmem:[%s5190_s5 + $0x38] sm:$0xff] }
 0x16c   :  { %v3511_v41 = vpop.f32.mrb[66].mxu0 }
 0x16d   :  { %v1157_v44 = vpop.f32.mrb[67].mxu0  ;;  %3667 = vmatmul.mubr.msk.f32.vlgmr.msra.gmra.mrb[0].mxu1 %vm1194_vm1, %v1113_v30  ;;  %v1163_v57 = vadd.f32 %v3511_v41, %v522_v53  ;;  %v2472_v30 = vpop.permute.xlu1 %2471 }
 0x16e   :  { %3669 = vmatprep.mubr.msk.f32.mxu1 %vm1194_vm1, %v1118_v40  ;;  %3853 = vmatpush3.bf16.msra.mxu1 %v3850_v10  ;;  %v1158_v54 = vadd.f32 %v1157_v44, %v517_v51  ;;  %v3874_v10 = vpack.c.bf16 %v2441_v49, %v2440_v2 }
 0x16f   :  { %3855 = vmatprep.subr.bf16.mxu1 %v3854_v35 }
 0x170   :  { %v3514_v45 = vpop.f32.mrb[68].mxu0 }
 0x171   :  { %v1167_v47 = vpop.f32.mrb[69].mxu0  ;;  %3670 = vmatmul.mubr.msk.f32.gmra.mrb[2].mxu1 %vm1194_vm1, %v1123_v43  ;;  %v1173_v60 = vadd.f32 %v3514_v45, %v532_v58 }
 0x172   :  { %3672 = vmatprep.mubr.msk.f32.mxu1 %vm1194_vm1, %v1128_v11  ;;  %3857 = vmatpush3.bf16.msra.mxu1 %v3854_v35  ;;  %v1168_v59 = vadd.f32 %v1167_v47, %v527_v56  ;;  %v2467_v35 = vpop.permute.xlu0 %2466  ;;  %v2482_v11 = vpop.permute.xlu1 %2481 }
 0x174   :  { %v3517_v15 = vpop.f32.mrb[70].mxu0 }
 0x175   :  { %v1177_v18 = vpop.f32.mrb[71].mxu0  ;;  %3673 = vmatmul.mubr.msk.f32.gmra.mrb[4].mxu1 %vm1194_vm1, %v1133_v13  ;;  %v1183_v62 = vadd.f32 %v3517_v15, %v542_v61 }
 0x176   :  { %3675 = vmatprep.mubr.msk.f32.mxu1 %vm1194_vm1, %v1138_v50  ;;  %v1178_v37 = vadd.f32 %v1177_v18, %v537_v31  ;;  %v2477_v47 = vpop.permute.xlu0 %2476 }
 0x179   :  { %3676 = vmatmul.mubr.msk.f32.gmra.mrb[6].mxu1 %vm1194_vm1, %v1143_v52 }
 0x17a   :  { %3686 = vmatprep.mubr.msk.f32.mxu1 %vm1194_vm1, %v1148_v22  ;;  %v2487_v61 = vpop.permute.xlu0 %2486 }
 0x17d   :  { %3687 = vmatmul.mubr.msk.f32.vlgmr.msra.gmra.mrb[0].mxu1 %vm1194_vm1, %v1153_v26 }
 0x17e   :  { %3689 = vmatprep.mubr.msk.f32.mxu1 %vm1194_vm1, %v1158_v54 }
 0x181   :  { %3690 = vmatmul.mubr.msk.f32.gmra.mrb[2].mxu1 %vm1194_vm1, %v1163_v57 }
 0x182   :  { %3692 = vmatprep.mubr.msk.f32.mxu1 %vm1194_vm1, %v1168_v59  ;;  %v2492_v59 = vpop.permute.xlu1 %2491 }
 0x185   :  { %3693 = vmatmul.mubr.msk.f32.gmra.mrb[4].mxu1 %vm1194_vm1, %v1173_v60 }
 0x186   :  { %3695 = vmatprep.mubr.msk.f32.mxu1 %vm1194_vm1, %v1178_v37 }
 0x189   :  { %3696 = vmatmul.mubr.msk.f32.gmra.mrb[6].mxu1 %vm1194_vm1, %v1183_v62 }
 0x18a   :  { %3758 = vmatprep.mubr.msk.f32.mxu1 %vm544_vm0, %v2817_v39 }
 0x250   :  { %v3688_v0 = vpop.f32.mrb[0].mxu1 }
 0x251   :  { %v2393_v9 = vpop.f32.mrb[1].mxu1 }
 0x252   :  { %v3858_v14 = vpack.c.bf16 %v3688_v0, %v2393_v9 }
 0x254   :  { %v3691_v24 = vpop.f32.mrb[2].mxu1  ;;  %3859 = vmatprep.subr.bf16.mxu0 %v3858_v14 }
 0x255   :  { %v2403_v42 = vpop.f32.mrb[3].mxu1  ;;  %3861 = vmatpush3.bf16.msra.mxu0 %v3858_v14 }
 0x256   :  { %v3862_v25 = vpack.c.bf16 %v3691_v24, %v2403_v42 }
 0x258   :  { %v3694_v19 = vpop.f32.mrb[4].mxu1  ;;  %3863 = vmatprep.subr.bf16.mxu0 %v3862_v25 }
 0x259   :  { %v2413_v1 = vpop.f32.mrb[5].mxu1  ;;  %3865 = vmatpush3.bf16.msra.mxu0 %v3862_v25 }
 0x25a   :  { %v3866_v12 = vpack.c.bf16 %v3694_v19, %v2413_v1 }
 0x25c   :  { %v3697_v55 = vpop.f32.mrb[6].mxu1  ;;  %3867 = vmatprep.subr.bf16.mxu0 %v3866_v12 }
 0x25d   :  { %v2423_v28 = vpop.f32.mrb[7].mxu1  ;;  %3869 = vmatpush3.bf16.msra.mxu0 %v3866_v12 }
 0x25e   :  { %v3870_v29 = vpack.c.bf16 %v3697_v55, %v2423_v28 }
 0x260   :  { %3871 = vmatprep.subr.bf16.mxu0 %v3870_v29 }
 0x261   :  { %3873 = vmatpush3.bf16.msra.mxu0 %v3870_v29  ;;  %v4007_v29 = vmov -1.0  }
 0x262   :  { %3875 = vmatprep.subr.bf16.mxu0 %v3874_v10 }
 0x265   :  { %3877 = vmatpush3.bf16.msra.mxu0 %v3874_v10 }
 0x266   :  { %3879 = vmatprep.subr.bf16.mxu0 %v3878_v16 }
 0x269   :  { %3881 = vmatpush3.bf16.msra.mxu0 %v3878_v16  ;;  %v2502_v16 = vpop.permute.xlu1 %2501 }
 0x26a   :  { %3883 = vmatprep.subr.bf16.mxu0 %v3882_v5 }
 0x26d   :  { %3885 = vmatpush3.bf16.msra.mxu0 %v3882_v5 }
 0x26e   :  { %3887 = vmatprep.subr.bf16.mxu0 %v3886_v17 }
 0x271   :  { %3889 = vmatpush3.bf16.msra.mxu0 %v3886_v17 }
 0x274   :  { %3731 = vmatmul.mubr.f32.vlgmr.msra.gmra.mrb[72].mxu0 %v2449_v6 }
 0x275   :  { %3733 = vmatprep.mubr.f32.mxu0 %v2450_v32 }
 0x278   :  { %3734 = vmatmul.mubr.f32.gmra.mrb[74].mxu0 %v2451_v33  ;;  %v2497_v33 = vpop.permute.xlu0 %2496 }
 0x279   :  { %3736 = vmatprep.mubr.f32.mxu0 %v2452_v34 }
 0x27c   :  { %3737 = vmatmul.mubr.f32.gmra.mrb[76].mxu0 %v2453_v36 }
 0x27d   :  { %3739 = vmatprep.mubr.f32.mxu0 %v2454_v7 }
 0x280   :  { %3740 = vmatmul.mubr.f32.gmra.mrb[78].mxu0 %v2455_v8 }
 0x347   :  { %v3732_v40 = vpop.f32.mrb[72].mxu0 }
 0x348   :  { %v2576_v41 = vadd.f32 %v3732_v40, %v2472_v30  ;;  %v2570_v44 = vpop.f32.mrb[73].mxu0 }
 0x349   :  { %v2571_v38 = vadd.f32 %v2570_v44, %v2467_v35 }
 0x34a   :  { %v2618_v43 = vmul.f32 0.70710677, %v2576_v41  ;;  %v5015_v19 = vmul.f32 0.5, %v2576_v41 }
 0x34b   :  { %v2617_v45 = vmul.f32 0.70710677, %v2571_v38  ;;  %v3735_v46 = vpop.f32.mrb[74].mxu0  ;;  %v5020_v2 = vmul.f32 0.5, %v2571_v38 }
 0x34c   :  { %v2642_v13 = vand.u32 2147483647, %v2618_v43  ;;  %v2586_v48 = vadd.f32 %v3735_v46, %v2482_v11  ;;  %v2580_v50 = vpop.f32.mrb[75].mxu0  ;;  %vm2626_vm2 = vcmp.ge.f32.partialorder %v2618_v43, 0.0 }
 0x34d   :  { %v2641_v15 = vand.u32 2147483647, %v2617_v45  ;;  %v5002_v18 = vadd.f32 %v2580_v50, %v2477_v47  ;;  %vm2625_vm3 = vcmp.ge.f32.partialorder %v2617_v45, 0.0  ;;  %v5025_v10 = vsel %vm2626_vm2, 1.0, %v4007_v29 }
 0x34e   :  { %v2650_v51 = vmul.f32 0.3275911, %v2642_v13  ;;  %v2620_v22 = vmul.f32 0.70710677, %v2586_v48  ;;  %v2746_v31 = vsub.f32 0.0, %v2642_v13  ;;  %v5028_v3 = vsel %vm2625_vm3, 1.0, %v4007_v29 }
 0x34f   :  { %v2649_v52 = vmul.f32 0.3275911, %v2641_v15  ;;  %v5005_v26 = vmul.f32 0.70710677, %v5002_v18  ;;  %v3738_v54 = vpop.f32.mrb[76].mxu0  ;;  %v2745_v24 = vsub.f32 0.0, %v2641_v15 }
 0x350   :  { %v2658_v53 = vadd.f32 1.0, %v2650_v51  ;;  %v2644_v57 = vand.u32 2147483647, %v2620_v22  ;;  %v2590_v58 = vpop.f32.mrb[77].mxu0  ;;  %v5008_v63 = vadd.f32 %v3738_v54, %v2492_v59  ;;  %v2754_v1 = vmul.f32 %v2746_v31, %v2642_v13 }
 0x351   :  { %v2657_v56 = vadd.f32 1.0, %v2649_v52  ;;  %v2643_v62 = vand.u32 2147483647, %v5005_v26  ;;  %v5010_v14 = vadd.f32 %v2590_v58, %v2487_v61  ;;  %vm2628_vm4 = vcmp.ge.f32.partialorder %v2620_v22, 0.0 }
 0x352   :  { %3974 = vrcp.f32 %v2658_v53  ;;  %v2652_v60 = vmul.f32 0.3275911, %v2644_v57  ;;  %v5013_v25 = vmul.f32 0.70710677, %v5008_v63  ;;  %v2748_v49 = vsub.f32 0.0, %v2644_v57 }
 0x353   :  { %3976 = vrcp.f32 %v2657_v56  ;;  %v3741_v37 = vpop.f32.mrb[78].mxu0  ;;  %v2651_v42 = vmul.f32 0.3275911, %v2643_v62  ;;  %v5018_v12 = vmul.f32 0.70710677, %v5010_v14  ;;  %v2753_v4 = vmul.f32 %v2745_v24, %v2641_v15 }
 0x354   :  { %v2600_v0 = vpop.f32.mrb[79].mxu0  ;;  %v2660_v9 = vadd.f32 1.0, %v2652_v60  ;;  %v2646_v28 = vand.u32 2147483647, %v5013_v25  ;;  %v5031_v21 = vmul.f32 0.5, %v2586_v48  ;;  %v2747_v27 = vsub.f32 0.0, %v2643_v62 }
 0x355   :  { %v2659_v55 = vadd.f32 1.0, %v2651_v42  ;;  %v2645_v23 = vand.u32 2147483647, %v5018_v12  ;;  %v2763_v20 = vmul.f32 1.442695, %v2754_v1  ;;  %v5033_v6 = vadd.f32 %v3741_v37, %v2502_v16 }
 0x356   :  { %3978 = vrcp.f32 %v2660_v9  ;;  %v2654_v5 = vmul.f32 0.3275911, %v2646_v28  ;;  %v5038_v34 = vsel %vm2628_vm4, 1.0, %v4007_v29  ;;  %v2756_v36 = vmul.f32 %v2748_v49, %v2644_v57 }
 0x357   :  { %3980 = vrcp.f32 %v2659_v55  ;;  %v2653_v17 = vmul.f32 0.3275911, %v2645_v23  ;;  %v2750_v8 = vsub.f32 0.0, %v2646_v28  ;;  %v2749_v40 = vsub.f32 0.0, %v2645_v23 }
 0x358   :  { %v2662_v7 = vadd.f32 1.0, %v2654_v5  ;;  %v5043_v41 = vadd.f32 %v2600_v0, %v2497_v33  ;;  %vm2627_vm5 = vcmp.ge.f32.partialorder %v5005_v26, 0.0  ;;  %v5048_v38 = vmul.f32 0.70710677, %v5033_v6 }
 0x359   :  { %v2661_v35 = vadd.f32 1.0, %v2653_v17  ;;  %v2761_v11 = vmul.f32 1.442695, %v2753_v4  ;;  %v2755_v45 = vmul.f32 %v2747_v27, %v2643_v62  ;;  %v2767_v47 = vmul.f32 1.442695, %v2756_v36 }
 0x35a   :  { %3982 = vrcp.f32 %v2662_v7  ;;  %v2648_v13 = vand.u32 2147483647, %v5048_v38  ;;  %v2758_v15 = vmul.f32 %v2750_v8, %v2646_v28  ;;  %v2757_v51 = vmul.f32 %v2749_v40, %v2645_v23 }
 0x35b   :  { %3984 = vrcp.f32 %v2661_v35  ;;  %v5055_v52 = vmul.f32 0.70710677, %v5043_v41  ;;  %v2765_v58 = vmul.f32 1.442695, %v2755_v45  ;;  %v5069_v23 = vsel %vm2627_vm5, 1.0, %v4007_v29 }
 0x35c   :  { %v5035_v32 = vpop.eup %3974  ;;  %3986 = vpow2.f32 %v2763_v20  ;;  %v2656_v54 = vmul.f32 0.3275911, %v2648_v13  ;;  %v2752_v56 = vsub.f32 0.0, %v2648_v13  ;;  %v2771_v24 = vmul.f32 1.442695, %v2758_v15 }
 0x35d   :  { %v5040_v39 = vpop.eup %3976  ;;  %v2674_v30 = vmul.f32 1.0614054, %v5035_v32  ;;  %3988 = vpow2.f32 %v2761_v11  ;;  %v2647_v59 = vand.u32 2147483647, %v5055_v52  ;;  %v2769_v55 = vmul.f32 1.442695, %v2757_v51 }
 0x35e   :  { %v2673_v44 = vmul.f32 1.0614054, %v5040_v39  ;;  %v2664_v61 = vadd.f32 1.0, %v2656_v54  ;;  %v2760_v62 = vmul.f32 %v2752_v56, %v2648_v13  ;;  %vm2630_vm6 = vcmp.ge.f32.partialorder %v5013_v25, 0.0 }
 0x35f   :  { %v2682_v43 = vadd.f32 -1.4531521, %v2674_v30  ;;  %v2655_v42 = vmul.f32 0.3275911, %v2647_v59  ;;  %vm2629_vm7 = vcmp.ge.f32.partialorder %v5018_v12, 0.0  ;;  %vm2632_vm8 = vcmp.ge.f32.partialorder %v5048_v38, 0.0 }
 0x360   :  { %v2681_v46 = vadd.f32 -1.4531521, %v2673_v44  ;;  %v5051_v48 = vpop.eup %3978  ;;  %3990 = vrcp.f32 %v2664_v61  ;;  %v2775_v17 = vmul.f32 1.442695, %v2760_v62  ;;  %v2751_v44 = vsub.f32 0.0, %v2647_v59 }
 0x361   :  { %v2690_v50 = vmul.f32 %v5035_v32, %v2682_v43  ;;  %v2676_v53 = vmul.f32 1.0614054, %v5051_v48  ;;  %v5060_v31 = vpop.eup %3980  ;;  %v2663_v4 = vadd.f32 1.0, %v2655_v42  ;;  %3992 = vpow2.f32 %v2767_v47 }
 0x362   :  { %v2689_v22 = vmul.f32 %v5040_v39, %v2681_v46  ;;  %v2675_v9 = vmul.f32 1.0614054, %v5060_v31  ;;  %v2637_v12 = vsel %vm2629_vm7, 1.0, %v4007_v29  ;;  %vm2631_vm9 = vcmp.ge.f32.partialorder %v5055_v52, 0.0  ;;  %v2818_v52 = vld [vmem:[%s5192_s7 + $0x8] sm:$0xff] }
 0x363   :  { %v2698_v57 = vadd.f32 1.4214138, %v2690_v50  ;;  %v2684_v37 = vadd.f32 -1.4531521, %v2676_v53  ;;  %3994 = vrcp.f32 %v2663_v4  ;;  %v2639_v38 = vsel %vm2631_vm9, 1.0, %v4007_v29 }
 0x364   :  { %v2697_v60 = vadd.f32 1.4214138, %v2689_v22  ;;  %v2683_v16 = vadd.f32 -1.4531521, %v2675_v9  ;;  %v5071_v5 = vpop.eup %3982  ;;  %3996 = vpow2.f32 %v2765_v58 }
 0x365   :  { %v2706_v0 = vmul.f32 %v5035_v32, %v2698_v57  ;;  %v2692_v49 = vmul.f32 %v5051_v48, %v2684_v37  ;;  %v5073_v33 = vpop.eup %3984  ;;  %v2678_v8 = vmul.f32 1.0614054, %v5071_v5  ;;  %3998 = vpow2.f32 %v2771_v24 }
 0x366   :  { %v2705_v1 = vmul.f32 %v5040_v39, %v2697_v60  ;;  %v2691_v7 = vmul.f32 %v5060_v31, %v2683_v16  ;;  %v3987_v26 = vpop.eup %3986  ;;  %v2677_v40 = vmul.f32 1.0614054, %v5073_v33  ;;  %v2759_v57 = vmul.f32 %v2751_v44, %v2647_v59 }
 0x367   :  { %v2714_v28 = vadd.f32 -0.28449672, %v2706_v0  ;;  %v2700_v27 = vadd.f32 1.4214138, %v2692_v49  ;;  %v2686_v45 = vadd.f32 -1.4531521, %v2678_v8  ;;  %v3989_v50 = vpop.eup %3988  ;;  %4000 = vpow2.f32 %v2769_v55 }
 0x368   :  { %v2713_v20 = vadd.f32 -0.28449672, %v2705_v1  ;;  %v2699_v11 = vadd.f32 1.4214138, %v2691_v7  ;;  %v2685_v13 = vadd.f32 -1.4531521, %v2677_v40  ;;  %4002 = vpow2.f32 %v2775_v17 }
 0x369   :  { %v2722_v36 = vmul.f32 %v5035_v32, %v2714_v28  ;;  %v2708_v35 = vmul.f32 %v5051_v48, %v2700_v27  ;;  %v2694_v22 = vmul.f32 %v5071_v5, %v2686_v45  ;;  %v2773_v55 = vmul.f32 1.442695, %v2759_v57 }
 0x36a   :  { %v2721_v30 = vmul.f32 %v5040_v39, %v2713_v20  ;;  %v2707_v51 = vmul.f32 %v5060_v31, %v2699_v11  ;;  %v2693_v56 = vmul.f32 %v5073_v33, %v2685_v13  ;;  %v5087_v58 = vpop.eup %3990 }
 0x36b   :  { %v2730_v43 = vadd.f32 0.2548296, %v2722_v36  ;;  %v2716_v47 = vadd.f32 -0.28449672, %v2708_v35  ;;  %v2702_v61 = vadd.f32 1.4214138, %v2694_v22  ;;  %v3993_v1 = vpop.eup %3992  ;;  %4004 = vpow2.f32 %v2773_v55 }
 0x36c   :  { %v2729_v46 = vadd.f32 0.2548296, %v2721_v30  ;;  %v2715_v37 = vadd.f32 -0.28449672, %v2707_v51  ;;  %v2701_v0 = vadd.f32 1.4214138, %v2693_v56 }
 0x36d   :  { %v2738_v15 = vmul.f32 %v5035_v32, %v2730_v43  ;;  %v2724_v54 = vmul.f32 %v5051_v48, %v2716_v47  ;;  %v2680_v42 = vmul.f32 1.0614054, %v5087_v58  ;;  %v5094_v16 = vpop.eup %3994 }
 0x36e   :  { %v2737_v53 = vmul.f32 %v5040_v39, %v2729_v46  ;;  %v2723_v24 = vmul.f32 %v5060_v31, %v2715_v37  ;;  %v2710_v39 = vmul.f32 %v5071_v5, %v2702_v61  ;;  %v2709_v28 = vmul.f32 %v5073_v33, %v2701_v0  ;;  %v3997_v44 = vpop.eup %3996 }
 0x36f   :  { %v2778_v60 = vmul.f32 %v3987_v26, %v2738_v15  ;;  %v2732_v32 = vadd.f32 0.2548296, %v2724_v54  ;;  %v2688_v17 = vadd.f32 -1.4531521, %v2680_v42  ;;  %v2679_v26 = vmul.f32 1.0614054, %v5094_v16  ;;  %v3999_v46 = vpop.eup %3998 }
 0x370   :  { %v2777_v62 = vmul.f32 %v3989_v50, %v2737_v53  ;;  %v2731_v20 = vadd.f32 0.2548296, %v2723_v24  ;;  %v2718_v27 = vadd.f32 -0.28449672, %v2710_v39  ;;  %v2717_v8 = vadd.f32 -0.28449672, %v2709_v28 }
 0x371   :  { %v2786_v9 = vsub.f32 1.0, %v2778_v60  ;;  %v2740_v59 = vmul.f32 %v5051_v48, %v2732_v32  ;;  %v2696_v40 = vmul.f32 %v5087_v58, %v2688_v17  ;;  %v2687_v45 = vadd.f32 -1.4531521, %v2679_v26  ;;  %v4001_v53 = vpop.eup %4000 }
 0x372   :  { %v2785_v49 = vsub.f32 1.0, %v2777_v62  ;;  %v2739_v35 = vmul.f32 %v5060_v31, %v2731_v20  ;;  %v2726_v48 = vmul.f32 %v5071_v5, %v2718_v27  ;;  %v4003_v60 = vpop.eup %4002  ;;  %v2611_v0 = vmul.f32 0.5, %v5002_v18 }
 0x373   :  { %v2794_v4 = vmul.f32 %v2786_v9, %v5025_v10  ;;  %v2780_v7 = vmul.f32 %v3993_v1, %v2740_v59  ;;  %v2725_v10 = vmul.f32 %v5073_v33, %v2717_v8  ;;  %v2704_v50 = vadd.f32 1.4214138, %v2696_v40 }
 0x374   :  { %v2793_v36 = vmul.f32 %v2785_v49, %v5028_v3  ;;  %v2779_v47 = vmul.f32 %v3997_v44, %v2739_v35  ;;  %v2734_v13 = vadd.f32 0.2548296, %v2726_v48  ;;  %v2695_v22 = vmul.f32 %v5094_v16, %v2687_v45 }
 0x375   :  { %v2802_v30 = vadd.f32 1.0, %v2794_v4  ;;  %v2788_v11 = vsub.f32 1.0, %v2780_v7  ;;  %v2733_v51 = vadd.f32 0.2548296, %v2725_v10  ;;  %v2712_v57 = vmul.f32 %v5087_v58, %v2704_v50  ;;  %v4005_v48 = vpop.eup %4004  ;;  %v2822_v50 = vld [vmem:[%s5192_s7 + $0x28] sm:$0xff] }
 0x376   :  { %v2801_v43 = vadd.f32 1.0, %v2793_v36  ;;  %v2787_v54 = vsub.f32 1.0, %v2779_v47  ;;  %v2742_v56 = vmul.f32 %v5071_v5, %v2734_v13  ;;  %v2703_v61 = vadd.f32 1.4214138, %v2695_v22  ;;  %v2836_v22 = vpop.permute.xlu0 %2835 }
 0x377   :  { %v2810_v3 = vmul.f32 %v2802_v30, %v5015_v19  ;;  %v2796_v31 = vmul.f32 %v2788_v11, %v5038_v34  ;;  %v2741_v37 = vmul.f32 %v5073_v33, %v2733_v51  ;;  %v2720_v32 = vadd.f32 -0.28449672, %v2712_v57  ;;  %v2841_v51 = vpop.permute.xlu1 %2840 }
 0x378   :  { %v2809_v15 = vmul.f32 %v2801_v43, %v5020_v2  ;;  %v2795_v2 = vmul.f32 %v2787_v54, %v5069_v23  ;;  %v2782_v34 = vmul.f32 %v3999_v46, %v2742_v56  ;;  %v2711_v5 = vmul.f32 %v5094_v16, %v2703_v61 }
 0x379   :  { %v2804_v19 = vadd.f32 1.0, %v2796_v31  ;;  %v2781_v9 = vmul.f32 %v4001_v53, %v2741_v37  ;;  %v2728_v33 = vmul.f32 %v5087_v58, %v2720_v32  ;;  %v2638_v23 = vsel %vm2630_vm6, 1.0, %v4007_v29  ;;  %v2824_v31 = vld [vmem:[%s5192_s7 + $0x38] sm:$0xff] }
 0x37a   :  { %v3890_v62 = vpack.c.bf16 %v2810_v3, %v2809_v15  ;;  %v2803_v39 = vadd.f32 1.0, %v2795_v2  ;;  %v2790_v42 = vsub.f32 1.0, %v2782_v34  ;;  %v2719_v49 = vadd.f32 -0.28449672, %v2711_v5  ;;  %v2823_v15 = vld [vmem:[%s5192_s7 + $0x30] sm:$0xff]  ;;  %v2846_v56 = vpop.permute.xlu0 %2845 }
 0x37b   :  { %v2812_v24 = vmul.f32 %v2804_v19, %v5031_v21  ;;  %v2789_v1 = vsub.f32 1.0, %v2781_v9  ;;  %v2736_v28 = vadd.f32 0.2548296, %v2728_v33  ;;  %v2614_v21 = vmul.f32 0.5, %v5008_v63  ;;  %v2851_v53 = vpop.permute.xlu1 %2850 }
 0x37c   :  { %3891 = vmatprep.subr.bf16.mxu1 %v3890_v62  ;;  %v2811_v18 = vmul.f32 %v2803_v39, %v2611_v0  ;;  %v2798_v59 = vmul.f32 %v2790_v42, %v2638_v23  ;;  %v2727_v4 = vmul.f32 %v5094_v16, %v2719_v49  ;;  %v2613_v36 = vmul.f32 0.5, %v5010_v14 }
 0x37d   :  { %3893 = vmatpush3.bf16.msra.mxu1 %v3890_v62  ;;  %v2797_v55 = vmul.f32 %v2789_v1, %v2637_v12  ;;  %v2744_v27 = vmul.f32 %v5087_v58, %v2736_v28  ;;  %v2640_v63 = vsel %vm2632_vm8, 1.0, %v4007_v29  ;;  %v2616_v10 = vmul.f32 0.5, %v5033_v6  ;;  %v2819_v29 = vld [vmem:[%s5192_s7 + $0x10] sm:$0xff]  ;;  %v2820_v6 = vld [vmem:[%s5192_s7 + $0x18] sm:$0xff] }
 0x37e   :  { %v2806_v20 = vadd.f32 1.0, %v2798_v59  ;;  %v3894_v17 = vpack.c.bf16 %v2812_v24, %v2811_v18  ;;  %v2735_v7 = vadd.f32 0.2548296, %v2727_v4  ;;  %v2615_v46 = vmul.f32 0.5, %v5043_v41  ;;  %v2821_v41 = vld [vmem:[%s5192_s7 + $0x20] sm:$0xff]  ;;  %v2856_v32 = vpop.permute.xlu0 %2855 }
 0x37f   :  { %v2805_v25 = vadd.f32 1.0, %v2797_v55  ;;  %v2784_v26 = vmul.f32 %v4003_v60, %v2744_v27  ;;  %v2861_v2 = vpop.permute.xlu1 %2860 }
 0x380   :  { %v2814_v8 = vmul.f32 %v2806_v20, %v2614_v21  ;;  %3895 = vmatprep.subr.bf16.mxu1 %v3894_v17  ;;  %v2743_v35 = vmul.f32 %v5094_v16, %v2735_v7 }
 0x381   :  { %v2813_v30 = vmul.f32 %v2805_v25, %v2613_v36  ;;  %3897 = vmatpush3.bf16.msra.mxu1 %v3894_v17  ;;  %v2792_v40 = vsub.f32 1.0, %v2784_v26 }
 0x382   :  { %v2783_v58 = vmul.f32 %v4005_v48, %v2743_v35  ;;  %v2866_v33 = vpop.permute.xlu0 %2865 }
 0x383   :  { %v3898_v44 = vpack.c.bf16 %v2814_v8, %v2813_v30  ;;  %v2800_v14 = vmul.f32 %v2792_v40, %v2640_v63  ;;  %v2871_v39 = vpop.permute.xlu1 %2870 }
 0x384   :  { %v2791_v43 = vsub.f32 1.0, %v2783_v58 }
 0x385   :  { %3899 = vmatprep.subr.bf16.mxu1 %v3898_v44  ;;  %v2808_v11 = vadd.f32 1.0, %v2800_v14 }
 0x386   :  { %3901 = vmatpush3.bf16.msra.mxu1 %v3898_v44  ;;  %v2799_v45 = vmul.f32 %v2791_v43, %v2639_v38 }
 0x387   :  { %v2816_v16 = vmul.f32 %v2808_v11, %v2616_v10 }
 0x388   :  { %v2807_v3 = vadd.f32 1.0, %v2799_v45 }
 0x38a   :  { %v2815_v47 = vmul.f32 %v2807_v3, %v2615_v46 }
 0x38c   :  { %v3902_v13 = vpack.c.bf16 %v2816_v16, %v2815_v47 }
 0x38e   :  { %3903 = vmatprep.subr.bf16.mxu1 %v3902_v13 }
 0x38f   :  { %3905 = vmatpush3.bf16.msra.mxu1 %v3902_v13 }
 0x392   :  { %3759 = vmatmul.mubr.msk.f32.vlgmr.msra.gmra.mrb[8].mxu1 %vm544_vm0, %v2818_v52 }
 0x393   :  { %3761 = vmatprep.mubr.msk.f32.mxu1 %vm544_vm0, %v2819_v29 }
 0x396   :  { %3762 = vmatmul.mubr.msk.f32.gmra.mrb[10].mxu1 %vm544_vm0, %v2820_v6 }
 0x397   :  { %3764 = vmatprep.mubr.msk.f32.mxu1 %vm544_vm0, %v2821_v41 }
 0x39a   :  { %3765 = vmatmul.mubr.msk.f32.gmra.mrb[12].mxu1 %vm544_vm0, %v2822_v50 }
 0x39b   :  { %3767 = vmatprep.mubr.msk.f32.mxu1 %vm544_vm0, %v2823_v15 }
 0x39e   :  { %3768 = vmatmul.mubr.msk.f32.gmra.mrb[14].mxu1 %vm544_vm0, %v2824_v31 }
 0x465   :  { %v3760_v54 = vpop.f32.mrb[8].mxu1 }
 0x466   :  { %v2969_v57 = vadd.f32 %v3760_v54, %v2841_v51  ;;  %v2963_v60 = vpop.f32.mrb[9].mxu1 }
 0x467   :  { %v2964_v19 = vadd.f32 %v2963_v60, %v2836_v22 }
 0x468   :  { %3003 = vst [vmem:[%s5193_s9 + $0x8] sm:$0xff] %v2969_v57 }
 0x469   :  { %3002 = vst [vmem:[%s5193_s9] sm:$0xff] %v2964_v19  ;;  %v3763_v37 = vpop.f32.mrb[10].mxu1 }
 0x46a   :  { %v2979_v61 = vadd.f32 %v3763_v37, %v2851_v53  ;;  %v2973_v62 = vpop.f32.mrb[11].mxu1 }
 0x46b   :  { %v2974_v34 = vadd.f32 %v2973_v62, %v2846_v56 }
 0x46c   :  { %3005 = vst [vmem:[%s5193_s9 + $0x18] sm:$0xff] %v2979_v61 }
 0x46d   :  { %3004 = vst [vmem:[%s5193_s9 + $0x10] sm:$0xff] %v2974_v34  ;;  %v3766_v0 = vpop.f32.mrb[12].mxu1 }
 0x46e   :  { %v2989_v9 = vadd.f32 %v3766_v0, %v2861_v2  ;;  %v2983_v5 = vpop.f32.mrb[13].mxu1 }
 0x46f   :  { %v2984_v24 = vadd.f32 %v2983_v5, %v2856_v32 }
 0x470   :  { %3007 = vst [vmem:[%s5193_s9 + $0x28] sm:$0xff] %v2989_v9 }
 0x471   :  { %3006 = vst [vmem:[%s5193_s9 + $0x20] sm:$0xff] %v2984_v24  ;;  %v3769_v42 = vpop.f32.mrb[14].mxu1 }
 0x472   :  { %v2999_v23 = vadd.f32 %v3769_v42, %v2871_v39  ;;  %v2993_v1 = vpop.f32.mrb[15].mxu1 }
 0x473   :  { %v2994_v49 = vadd.f32 %v2993_v1, %v2866_v33 }
 0x474   :  { %3009 = vst [vmem:[%s5193_s9 + $0x38] sm:$0xff] %v2999_v23 }
 0x475   :  { %3008 = vst [vmem:[%s5193_s9 + $0x30] sm:$0xff] %v2994_v49 }

</bundles_post_ra>
